<compile_context>
chip_gen: v7x
topology: tpu7x:2x2x1
jax: 0.10.0
libtpu: 0.0.40
codegen_flags: <defaults>
</compile_context>

<pallas_src>
import functools

import jax
import jax.numpy as jnp
from jax.experimental import pallas as pl
from jax.experimental.pallas import tpu as pltpu


def _round_up(x, m):
    return (x + m - 1) // m * m


def _choose_tile(n):
    """Pick tile in {128,256,512,1024} minimizing round_up(n, tile)."""
    best_tile, best_pad = None, None
    for t in (128, 256, 512, 1024):
        pad = _round_up(max(n, 1), t)
        if best_pad is None or pad < best_pad or (pad == best_pad and t > best_tile):
            best_tile, best_pad = t, pad
    return best_tile, best_pad


def _vmem_capacity_bytes():
    # v5e/v6e: 128 MiB VMEM, v7x: 64 MiB.  Conservative fallback = 64 MiB.
    try:
        return int(pltpu.get_tpu_info().vmem_capacity_bytes)
    except Exception:
        return 64 * 1024 * 1024


# ----------------------------------------------------------------------------
# Kernels
# ----------------------------------------------------------------------------
def _project_kernel(x_ref, w_ref, b_ref, o_ref, *, add_bias):
    # (tile, F_in) @ (F_in, F_out) on the MXU, f32 accumulation.
    out = jnp.dot(x_ref[...], w_ref[...], preferred_element_type=jnp.float32)
    if add_bias:                     # only for K == 0
        out = out + b_ref[...]
    o_ref[...] = out.astype(o_ref.dtype)


def _fused_prop_kernel(a_ref, h0_ref, b_ref, o_ref, hbuf_ref, acc_ref, *,
                       tile, last_layer, resident_a):
    """All K layers of h <- S @ h in one grid: (layer, row_tile, k_tile)."""
    l = pl.program_id(0)
    i = pl.program_id(1)
    k = pl.program_id(2)
    n_k = pl.num_programs(2)

    @pl.when(k == 0)
    def _():
        acc_ref[...] = jnp.zeros_like(acc_ref)

    if resident_a:
        # Whole padded S lives in VMEM across all layers; slice the tile out.
        r = pl.multiple_of(i * tile, tile)
        c = pl.multiple_of(k * tile, tile)
        a_blk = a_ref[pl.ds(r, tile), pl.ds(c, tile)]
    else:
        # Streamed / double-buffered (tile, tile) block.
        a_blk = a_ref[...]

    kk = pl.multiple_of(k * tile, tile)

    def _accum(h_blk):
        acc_ref[...] += jnp.dot(a_blk, h_blk,
                                preferred_element_type=jnp.float32)

    # Layer 0 reads the projected h0 streamed from HBM; layer l>0 reads the
    # VMEM ping-pong slot written by layer l-1 (no HBM round trip for h).
    @pl.when(l == 0)
    def _():
        _accum(h0_ref[...])

    @pl.when(jnp.logical_and(l > 0, l % 2 == 1))
    def _():
        _accum(hbuf_ref[0, pl.ds(kk, tile), :])

    @pl.when(jnp.logical_and(l > 0, l % 2 == 0))
    def _():
        _accum(hbuf_ref[1, pl.ds(kk, tile), :])

    @pl.when(k == n_k - 1)
    def _():
        @pl.when(l == last_layer)
        def _():
            o_ref[...] = (acc_ref[...] + b_ref[...]).astype(o_ref.dtype)

        @pl.when(l != last_layer)
        def _():
            val = acc_ref[...].astype(jnp.bfloat16)
            rr = pl.multiple_of(i * tile, tile)

            @pl.when(l % 2 == 0)
            def _():
                hbuf_ref[0, pl.ds(rr, tile), :] = val

            @pl.when(l % 2 == 1)
            def _():
                hbuf_ref[1, pl.ds(rr, tile), :] = val


def _propagate_kernel(a_ref, h_ref, b_ref, o_ref, acc_ref, *, add_bias):
    """Un-fused fallback: one layer of S @ h, tiled over (row, k)."""
    k = pl.program_id(1)

    @pl.when(k == 0)
    def _():
        acc_ref[...] = jnp.zeros_like(acc_ref)

    acc_ref[...] += jnp.dot(a_ref[...], h_ref[...],
                            preferred_element_type=jnp.float32)

    @pl.when(k == pl.num_programs(1) - 1)
    def _():
        out = acc_ref[...]
        if add_bias:
            out = out + b_ref[...]
        o_ref[...] = out.astype(o_ref.dtype)


# ----------------------------------------------------------------------------
# Wrapper
# ----------------------------------------------------------------------------
def _pad2(arr, shape, dtype):
    if tuple(arr.shape) == tuple(shape) and arr.dtype == dtype:
        return arr
    out = jnp.zeros(shape, dtype)
    return out.at[: arr.shape[0], : arr.shape[1]].set(arr.astype(dtype))


@functools.partial(jax.jit, static_argnums=(4,))
def sgc_forward_pallas(a_norm, x, weight_t, bias, num_layers):
    """a_norm: (N,N) or pre-padded (n_pad,n_pad) normalized adjacency (zero
    padding), x: (N,F_in), weight_t: (F_in,F_out), bias: (F_out,)."""
    N, f_in = x.shape
    f_out = weight_t.shape[1]

    f32, bf16 = jnp.float32, jnp.bfloat16
    tile, n_pad = _choose_tile(N)
    fi_pad = _round_up(f_in, 128)
    fo_pad = _round_up(f_out, 128)
    n_tiles = n_pad // tile

    # ---- pad / cast inputs (skip copies when already aligned) --------------
    if a_norm.shape[0] == n_pad:
        a_p = a_norm.astype(bf16)
    else:
        a_p = _pad2(a_norm, (n_pad, n_pad), bf16)
    x_p = _pad2(x, (n_pad, fi_pad), f32)
    w_p = _pad2(weight_t, (fi_pad, fo_pad), f32)
    b_p = _pad2(bias.reshape(1, -1), (1, fo_pad), f32)

    # ---- per-chip VMEM budget (v7x: 64 MiB, v5e/v6e: 128 MiB) --------------
    vmem_cap = _vmem_capacity_bytes()
    vmem_budget = (vmem_cap * 3) // 4            # headroom for the compiler
    vmem_limit = min(vmem_budget, 96 * 1024 * 1024)

    # ---- 1) projection: h0 = x @ W (f32 inputs, bf16 output for K >= 1) ----
    proj_dtype = f32 if num_layers == 0 else bf16
    h0 = pl.pallas_call(
        functools.partial(_project_kernel, add_bias=(num_layers == 0)),
        out_shape=jax.ShapeDtypeStruct((n_pad, fo_pad), proj_dtype),
        grid=(n_tiles,),
        in_specs=[
            pl.BlockSpec((tile, fi_pad), lambda i: (i, 0)),
            pl.BlockSpec((fi_pad, fo_pad), lambda i: (0, 0)),   # resident W
            pl.BlockSpec((1, fo_pad), lambda i: (0, 0)),        # resident b
        ],
        out_specs=pl.BlockSpec((tile, fo_pad), lambda i: (i, 0)),
        compiler_params=pltpu.CompilerParams(
            dimension_semantics=("parallel",),
            vmem_limit_bytes=vmem_limit),
        cost_estimate=pl.CostEstimate(
            flops=2 * n_pad * fi_pad * fo_pad,
            transcendentals=0,
            bytes_accessed=4 * (n_pad * fi_pad + fi_pad * fo_pad)
            + 2 * n_pad * fo_pad),
    )(x_p, w_p, b_p)

    if num_layers == 0:
        return h0[:N, :f_out]

    # ---- VMEM footprint estimates for the fused propagation ----------------
    hbuf_bytes = 2 * n_pad * fo_pad * 2                  # bf16 ping-pong h
    blk_bytes = (2 * tile * fo_pad * 2                   # h0 blocks (x2 buf)
                 + 2 * tile * fo_pad * 4                 # out blocks (x2 buf)
                 + tile * fo_pad * 4                     # f32 accumulator
                 + 2 * fo_pad * 4 + (1 << 20))           # bias + slack
    a_stream_bytes = 2 * tile * tile * 2                 # double-buffered A
    a_res_bytes = 2 * n_pad * n_pad * 2                  # worst case 2x buf

    resident_a = (n_pad > tile) and (
        a_res_bytes + hbuf_bytes + blk_bytes <= vmem_budget)
    fused_ok = a_stream_bytes + hbuf_bytes + blk_bytes <= vmem_budget

    if fused_ok:
        # ---- 2) all K propagation layers in ONE pallas_call -----------------
        last = num_layers - 1
        if resident_a:
            a_spec = pl.BlockSpec((n_pad, n_pad), lambda l, i, k: (0, 0))
        else:
            a_spec = pl.BlockSpec((tile, tile), lambda l, i, k: (i, k))
        a_bytes = (1 if resident_a else num_layers) * n_pad * n_pad * 2
        out = pl.pallas_call(
            functools.partial(_fused_prop_kernel, tile=tile,
                              last_layer=last, resident_a=resident_a),
            out_shape=jax.ShapeDtypeStruct((n_pad, fo_pad), f32),
            grid=(num_layers, n_tiles, n_tiles),
            in_specs=[
                a_spec,
                # h0 is only streamed during layer 0 (constant index after).
                pl.BlockSpec((tile, fo_pad),
                             lambda l, i, k: (jnp.where(l == 0, k, 0), 0)),
                pl.BlockSpec((1, fo_pad), lambda l, i, k: (0, 0)),  # bias
            ],
            # Output blocks only touched during the last layer; keep the block
            # index constant before that so no garbage writebacks happen.
            out_specs=pl.BlockSpec(
                (tile, fo_pad),
                lambda l, i, k: (jnp.where(l == last, i, 0), 0)),
            scratch_shapes=[
                pltpu.VMEM((2, n_pad, fo_pad), bf16),    # h ping-pong
                pltpu.VMEM((tile, fo_pad), f32),         # accumulator
            ],
            # h lives in VMEM scratch across row tiles / layers, so the grid
            # must run sequentially on one core (no "parallel" axes here).
            compiler_params=pltpu.CompilerParams(
                dimension_semantics=("arbitrary", "arbitrary", "arbitrary"),
                vmem_limit_bytes=vmem_limit),
            cost_estimate=pl.CostEstimate(
                flops=2 * num_layers * n_pad * n_pad * fo_pad,
                transcendentals=0,
                bytes_accessed=a_bytes + 2 * n_pad * fo_pad
                + 4 * n_pad * fo_pad),
        )(a_p, h0, b_p)
        return out[:N, :f_out]

    # ---- fallback: un-fused per-layer streaming (huge graphs) ---------------
    def make_prop(add_bias, out_dtype):
        return pl.pallas_call(
            functools.partial(_propagate_kernel, add_bias=add_bias),
            out_shape=jax.ShapeDtypeStruct((n_pad, fo_pad), out_dtype),
            grid=(n_tiles, n_tiles),
            in_specs=[
                pl.BlockSpec((tile, tile), lambda i, k: (i, k)),
                pl.BlockSpec((tile, fo_pad), lambda i, k: (k, 0)),
                pl.BlockSpec((1, fo_pad), lambda i, k: (0, 0)),
            ],
            out_specs=pl.BlockSpec((tile, fo_pad), lambda i, k: (i, 0)),
            scratch_shapes=[pltpu.VMEM((tile, fo_pad), f32)],
            compiler_params=pltpu.CompilerParams(
                dimension_semantics=("parallel", "arbitrary"),
                vmem_limit_bytes=vmem_limit),
            cost_estimate=pl.CostEstimate(
                flops=2 * n_pad * n_pad * fo_pad,
                transcendentals=0,
                bytes_accessed=2 * n_pad * n_pad
                + (n_tiles + 1) * n_pad * fo_pad * 2),
        )

    prop_mid = make_prop(False, bf16)
    prop_last = make_prop(True, f32)
    h = h0
    for _ in range(num_layers - 1):
        h = prop_mid(a_p, h, b_p)
    h = prop_last(a_p, h, b_p)
    return h[:N, :f_out]


# ----------------------------------------------------------------------------
# Glue: S = D^{-1/2}(A + I)D^{-1/2} built densely directly at the padded shape
# (gcn_norm with add_self_loops=True, matching PyG SGConv semantics).
# ----------------------------------------------------------------------------
def build_norm_adj(edge_index, num_nodes, pad_to=None):
    n_pad = num_nodes if pad_to is None else pad_to
    row, col = edge_index[0], edge_index[1]
    loops = jnp.arange(num_nodes, dtype=edge_index.dtype)
    row = jnp.concatenate([row, loops])
    col = jnp.concatenate([col, loops])
    ew = jnp.ones(row.shape[0], dtype=jnp.float32)

    deg = jnp.zeros((num_nodes,), jnp.float32).at[col].add(ew)
    deg_inv_sqrt = jnp.where(deg > 0, jax.lax.rsqrt(deg), 0.0)
    norm = deg_inv_sqrt[row] * ew * deg_inv_sqrt[col]

    # out[i] = sum_{(j->i)} norm * x[j]  =>  A_dense[i, j]; padded region = 0.
    a = jnp.zeros((n_pad, n_pad), jnp.float32).at[col, row].add(norm)
    return a


# ----------------------------------------------------------------------------
# Pure-JAX f32 reference (original operation order: (S^K x) W + b)
# ----------------------------------------------------------------------------
def sgc_reference(a_norm, x, weight_t, bias, num_layers):
    h = x
    for _ in range(num_layers):
        h = a_norm @ h
    return h @ weight_t + bias


if __name__ == "__main__":
    key = jax.random.PRNGKey(0)
    k_x, k_e, k_w, k_b = jax.random.split(key, 4)

    # small synthetic graph
    num_nodes = 16
    in_channels = 16
    out_channels = 8
    num_layers = 2
    num_edges = 40

    x = jax.random.normal(k_x, (num_nodes, in_channels), dtype=jnp.float32)
    edge_index = jax.random.randint(
        k_e, (2, num_edges), minval=0, maxval=num_nodes, dtype=jnp.int32)

    # torch Linear params: weight (out, in), bias (out,)
    weight = jax.random.normal(
        k_w, (out_channels, in_channels), dtype=jnp.float32
    ) * (1.0 / jnp.sqrt(in_channels))
    bias = jax.random.normal(k_b, (out_channels,), dtype=jnp.float32) * 0.01
    weight_t = weight.T  # (in, out) layout used by the kernel

    # Build S directly at the padded node size (avoids an extra N_pad^2 copy).
    _, n_pad = _choose_tile(num_nodes)
    a_norm = build_norm_adj(edge_index, num_nodes, pad_to=n_pad)

    out = sgc_forward_pallas(a_norm, x, weight_t, bias, num_layers)
    out = jax.block_until_ready(out)

    ref = sgc_reference(a_norm[:num_nodes, :num_nodes], x, weight_t, bias,
                        num_layers)
    assert out.shape == (num_nodes, out_channels)
    # Propagation runs in bf16 (f32 accumulation) -> tolerance loosened vs f32.
    assert jnp.allclose(out, ref, atol=2e-2, rtol=2e-2), float(
        jnp.max(jnp.abs(out - ref)))

    print("KERNEL_OK")
</pallas_src>

<mosaic_0001>
module attributes {stable_mosaic.version = 11 : i64} {
  func.func @_project_kernel(%arg0: i32, %arg1: memref<128x128xf32, #tpu.memory_space<vmem>>, %arg2: memref<128x128xf32, #tpu.memory_space<vmem>>, %arg3: memref<1x128xf32, #tpu.memory_space<vmem>>, %arg4: memref<128x128xbf16, #tpu.memory_space<vmem>>) attributes {dimension_semantics = [#tpu.dimension_semantics<parallel>], iteration_bounds = array<i64: 1>, scalar_prefetch = 0 : i64, scratch_operands = 0 : i64, tpu.core_type = #tpu.core_type<tc>, window_params = [{transform_indices = @transform_0, window_bounds = array<i64: 128, 128>}, {pipeline_mode = #tpu.pipeline_mode<synchronous>, transform_indices = @transform_1, window_bounds = array<i64: 128, 128>}, {pipeline_mode = #tpu.pipeline_mode<synchronous>, transform_indices = @transform_2, window_bounds = array<i64: 1, 128>}, {transform_indices = @transform_3, window_bounds = array<i64: 128, 128>}]} {
    %c0 = arith.constant 0 : index
    %c0_0 = arith.constant 0 : index
    %0 = vector.load %arg1[%c0, %c0_0] : memref<128x128xf32, #tpu.memory_space<vmem>>, vector<128x128xf32>
    %c0_1 = arith.constant 0 : index
    %c0_2 = arith.constant 0 : index
    %1 = vector.load %arg2[%c0_1, %c0_2] : memref<128x128xf32, #tpu.memory_space<vmem>>, vector<128x128xf32>
    %cst = arith.constant dense<0.000000e+00> : vector<128x128xf32>
    %2 = tpu.matmul %0, %1, %cst {dimension_numbers = #tpu.dot_dimension_numbers<[1], [0], [0], [1], [0, 0, 1, 1], [], []>} : vector<128x128xf32>, vector<128x128xf32>, vector<128x128xf32> -> vector<128x128xf32>
    %3 = arith.truncf %2 : vector<128x128xf32> to vector<128x128xbf16>
    %c0_3 = arith.constant 0 : index
    %c0_4 = arith.constant 0 : index
    %4 = vector.load %arg4[%c0_3, %c0_4] : memref<128x128xbf16, #tpu.memory_space<vmem>>, vector<128x128xbf16>
    tpu.vector_store %arg4[%c0_3, %c0_4], %3 {strides = array<i32>} : memref<128x128xbf16, #tpu.memory_space<vmem>>, vector<128x128xbf16>,
    return
  }
  func.func @transform_0(%arg0: i32) -> (i32, i32) {
    %c0_i32 = arith.constant 0 : i32
    %c0_i32_0 = arith.constant 0 : i32
    return %arg0, %c0_i32 : i32, i32
  }
  func.func @transform_1(%arg0: i32) -> (i32, i32) {
    %c0_i32 = arith.constant 0 : i32
    %c0_i32_0 = arith.constant 0 : i32
    %c0_i32_1 = arith.constant 0 : i32
    return %c0_i32, %c0_i32_0 : i32, i32
  }
  func.func @transform_2(%arg0: i32) -> (i32, i32) {
    %c0_i32 = arith.constant 0 : i32
    %c0_i32_0 = arith.constant 0 : i32
    %c0_i32_1 = arith.constant 0 : i32
    return %c0_i32, %c0_i32_0 : i32, i32
  }
  func.func @transform_3(%arg0: i32) -> (i32, i32) {
    %c0_i32 = arith.constant 0 : i32
    %c0_i32_0 = arith.constant 0 : i32
    return %arg0, %c0_i32 : i32, i32
  }
}

module attributes {stable_mosaic.version = 11 : i64} {
  func.func @_fused_prop_kernel(%arg0: i32, %arg1: i32, %arg2: i32, %arg3: memref<128x128xbf16, #tpu.memory_space<vmem>>, %arg4: memref<128x128xbf16, #tpu.memory_space<vmem>>, %arg5: memref<1x128xf32, #tpu.memory_space<vmem>>, %arg6: memref<128x128xf32, #tpu.memory_space<vmem>>, %arg7: memref<2x128x128xbf16, #tpu.memory_space<vmem>>, %arg8: memref<128x128xf32, #tpu.memory_space<vmem>>) attributes {dimension_semantics = [#tpu.dimension_semantics<arbitrary>, #tpu.dimension_semantics<arbitrary>, #tpu.dimension_semantics<arbitrary>], iteration_bounds = array<i64: 2, 1, 1>, scalar_prefetch = 0 : i64, scratch_operands = 2 : i64, tpu.core_type = #tpu.core_type<tc>, window_params = [{transform_indices = @transform_0, window_bounds = array<i64: 128, 128>}, {transform_indices = @transform_1, window_bounds = array<i64: 128, 128>}, {pipeline_mode = #tpu.pipeline_mode<synchronous>, transform_indices = @transform_2, window_bounds = array<i64: 1, 128>}, {transform_indices = @transform_3, window_bounds = array<i64: 128, 128>}]} {
    %c0_i32 = arith.constant 0 : i32
    %0 = arith.cmpi eq, %arg2, %c0_i32 : i32
    %1 = arith.extui %0 : i1 to i32
    %c0_i32_0 = arith.constant 0 : i32
    %2 = arith.cmpi ne, %1, %c0_i32_0 : i32
    scf.if %2 {
      %cst = arith.constant 0.000000e+00 : f32
      %42 = vector.broadcast %cst : f32 to vector<128x128xf32>
      %c0_22 = arith.constant 0 : index
      %c0_23 = arith.constant 0 : index
      %43 = vector.load %arg8[%c0_22, %c0_23] : memref<128x128xf32, #tpu.memory_space<vmem>>, vector<128x128xf32>
      tpu.vector_store %arg8[%c0_22, %c0_23], %42 {strides = array<i32>} : memref<128x128xf32, #tpu.memory_space<vmem>>, vector<128x128xf32>,
    } else {
    }
    %c0 = arith.constant 0 : index
    %c0_1 = arith.constant 0 : index
    %3 = vector.load %arg3[%c0, %c0_1] : memref<128x128xbf16, #tpu.memory_space<vmem>>, vector<128x128xbf16>
    %c128_i32 = arith.constant 128 : i32
    %4 = arith.muli %arg2, %c128_i32 : i32
    %5 = tpu.assume_multiple %4, 128 : i32
    %c0_i32_2 = arith.constant 0 : i32
    %6 = arith.cmpi eq, %arg0, %c0_i32_2 : i32
    %7 = arith.extui %6 : i1 to i32
    %c0_i32_3 = arith.constant 0 : i32
    %8 = arith.cmpi ne, %7, %c0_i32_3 : i32
    scf.if %8 {
      %c0_22 = arith.constant 0 : index
      %c0_23 = arith.constant 0 : index
      %42 = vector.load %arg4[%c0_22, %c0_23] : memref<128x128xbf16, #tpu.memory_space<vmem>>, vector<128x128xbf16>
      %c0_24 = arith.constant 0 : index
      %c0_25 = arith.constant 0 : index
      %43 = vector.load %arg8[%c0_24, %c0_25] : memref<128x128xf32, #tpu.memory_space<vmem>>, vector<128x128xf32>
      %cst = arith.constant dense<0.000000e+00> : vector<128x128xf32>
      %44 = tpu.matmul %3, %42, %cst {dimension_numbers = #tpu.dot_dimension_numbers<[1], [0], [0], [1], [0, 0, 1, 1], [], []>} : vector<128x128xbf16>, vector<128x128xbf16>, vector<128x128xf32> -> vector<128x128xf32>
      %45 = arith.addf %43, %44 : vector<128x128xf32>
      %c0_26 = arith.constant 0 : index
      %c0_27 = arith.constant 0 : index
      %46 = vector.load %arg8[%c0_26, %c0_27] : memref<128x128xf32, #tpu.memory_space<vmem>>, vector<128x128xf32>
      tpu.vector_store %arg8[%c0_26, %c0_27], %45 {strides = array<i32>} : memref<128x128xf32, #tpu.memory_space<vmem>>, vector<128x128xf32>,
    } else {
    }
    %c0_i32_4 = arith.constant 0 : i32
    %9 = arith.cmpi sgt, %arg0, %c0_i32_4 : i32
    %c2_i32 = arith.constant 2 : i32
    %c0_i32_5 = arith.constant 0 : i32
    %10 = arith.cmpi eq, %c2_i32, %c0_i32_5 : i32
    %c1_i32 = arith.constant 1 : i32
    %11 = arith.select %10, %c1_i32, %c2_i32 : i32
    %12 = arith.remsi %arg0, %11 : i32
    %c0_i32_6 = arith.constant 0 : i32
    %13 = arith.cmpi ne, %12, %c0_i32_6 : i32
    %c0_i32_7 = arith.constant 0 : i32
    %14 = arith.cmpi slt, %12, %c0_i32_7 : i32
    %c0_i32_8 = arith.constant 0 : i32
    %15 = arith.cmpi slt, %11, %c0_i32_8 : i32
    %16 = arith.xori %14, %15 : i1
    %17 = arith.andi %16, %13 : i1
    %18 = arith.addi %12, %11 : i32
    %19 = arith.select %17, %18, %12 : i32
    %c1_i32_9 = arith.constant 1 : i32
    %20 = arith.cmpi eq, %19, %c1_i32_9 : i32
    %21 = arith.andi %9, %20 : i1
    %22 = arith.extui %21 : i1 to i32
    %c0_i32_10 = arith.constant 0 : i32
    %23 = arith.cmpi ne, %22, %c0_i32_10 : i32
    scf.if %23 {
      %c0_22 = arith.constant 0 : index
      %42 = arith.index_cast %5 : i32 to index
      %c0_23 = arith.constant 0 : index
      %43 = vector.load %arg7[%c0_22, %42, %c0_23] : memref<2x128x128xbf16, #tpu.memory_space<vmem>>, vector<1x128x128xbf16>
      %44 = vector.shape_cast %43 : vector<1x128x128xbf16> to vector<128x128xbf16>
      %c0_24 = arith.constant 0 : index
      %c0_25 = arith.constant 0 : index
      %45 = vector.load %arg8[%c0_24, %c0_25] : memref<128x128xf32, #tpu.memory_space<vmem>>, vector<128x128xf32>
      %cst = arith.constant dense<0.000000e+00> : vector<128x128xf32>
      %46 = tpu.matmul %3, %44, %cst {dimension_numbers = #tpu.dot_dimension_numbers<[1], [0], [0], [1], [0, 0, 1, 1], [], []>} : vector<128x128xbf16>, vector<128x128xbf16>, vector<128x128xf32> -> vector<128x128xf32>
      %47 = arith.addf %45, %46 : vector<128x128xf32>
      %c0_26 = arith.constant 0 : index
      %c0_27 = arith.constant 0 : index
      %48 = vector.load %arg8[%c0_26, %c0_27] : memref<128x128xf32, #tpu.memory_space<vmem>>, vector<128x128xf32>
      tpu.vector_store %arg8[%c0_26, %c0_27], %47 {strides = array<i32>} : memref<128x128xf32, #tpu.memory_space<vmem>>, vector<128x128xf32>,
    } else {
    }
    %c0_i32_11 = arith.constant 0 : i32
    %24 = arith.cmpi sgt, %arg0, %c0_i32_11 : i32
    %c2_i32_12 = arith.constant 2 : i32
    %c0_i32_13 = arith.constant 0 : i32
    %25 = arith.cmpi eq, %c2_i32_12, %c0_i32_13 : i32
    %c1_i32_14 = arith.constant 1 : i32
    %26 = arith.select %25, %c1_i32_14, %c2_i32_12 : i32
    %27 = arith.remsi %arg0, %26 : i32
    %c0_i32_15 = arith.constant 0 : i32
    %28 = arith.cmpi ne, %27, %c0_i32_15 : i32
    %c0_i32_16 = arith.constant 0 : i32
    %29 = arith.cmpi slt, %27, %c0_i32_16 : i32
    %c0_i32_17 = arith.constant 0 : i32
    %30 = arith.cmpi slt, %26, %c0_i32_17 : i32
    %31 = arith.xori %29, %30 : i1
    %32 = arith.andi %31, %28 : i1
    %33 = arith.addi %27, %26 : i32
    %34 = arith.select %32, %33, %27 : i32
    %c0_i32_18 = arith.constant 0 : i32
    %35 = arith.cmpi eq, %34, %c0_i32_18 : i32
    %36 = arith.andi %24, %35 : i1
    %37 = arith.extui %36 : i1 to i32
    %c0_i32_19 = arith.constant 0 : i32
    %38 = arith.cmpi ne, %37, %c0_i32_19 : i32
    scf.if %38 {
      %c1 = arith.constant 1 : index
      %42 = arith.index_cast %5 : i32 to index
      %c0_22 = arith.constant 0 : index
      %43 = vector.load %arg7[%c1, %42, %c0_22] : memref<2x128x128xbf16, #tpu.memory_space<vmem>>, vector<1x128x128xbf16>
      %44 = vector.shape_cast %43 : vector<1x128x128xbf16> to vector<128x128xbf16>
      %c0_23 = arith.constant 0 : index
      %c0_24 = arith.constant 0 : index
      %45 = vector.load %arg8[%c0_23, %c0_24] : memref<128x128xf32, #tpu.memory_space<vmem>>, vector<128x128xf32>
      %cst = arith.constant dense<0.000000e+00> : vector<128x128xf32>
      %46 = tpu.matmul %3, %44, %cst {dimension_numbers = #tpu.dot_dimension_numbers<[1], [0], [0], [1], [0, 0, 1, 1], [], []>} : vector<128x128xbf16>, vector<128x128xbf16>, vector<128x128xf32> -> vector<128x128xf32>
      %47 = arith.addf %45, %46 : vector<128x128xf32>
      %c0_25 = arith.constant 0 : index
      %c0_26 = arith.constant 0 : index
      %48 = vector.load %arg8[%c0_25, %c0_26] : memref<128x128xf32, #tpu.memory_space<vmem>>, vector<128x128xf32>
      tpu.vector_store %arg8[%c0_25, %c0_26], %47 {strides = array<i32>} : memref<128x128xf32, #tpu.memory_space<vmem>>, vector<128x128xf32>,
    } else {
    }
    %c0_i32_20 = arith.constant 0 : i32
    %39 = arith.cmpi eq, %arg2, %c0_i32_20 : i32
    %40 = arith.extui %39 : i1 to i32
    %c0_i32_21 = arith.constant 0 : i32
    %41 = arith.cmpi ne, %40, %c0_i32_21 : i32
    scf.if %41 {
      %c1_i32_22 = arith.constant 1 : i32
      %42 = arith.cmpi eq, %arg0, %c1_i32_22 : i32
      %43 = arith.extui %42 : i1 to i32
      %c0_i32_23 = arith.constant 0 : i32
      %44 = arith.cmpi ne, %43, %c0_i32_23 : i32
      scf.if %44 {
        %c0_26 = arith.constant 0 : index
        %c0_27 = arith.constant 0 : index
        %48 = vector.load %arg8[%c0_26, %c0_27] : memref<128x128xf32, #tpu.memory_space<vmem>>, vector<128x128xf32>
        %c0_28 = arith.constant 0 : index
        %c0_29 = arith.constant 0 : index
        %49 = vector.load %arg5[%c0_28, %c0_29] : memref<1x128xf32, #tpu.memory_space<vmem>>, vector<1x128xf32>
        %50 = vector.broadcast %49 : vector<1x128xf32> to vector<128x128xf32>
        %51 = arith.addf %48, %50 : vector<128x128xf32>
        %c0_30 = arith.constant 0 : index
        %c0_31 = arith.constant 0 : index
        %52 = vector.load %arg6[%c0_30, %c0_31] : memref<128x128xf32, #tpu.memory_space<vmem>>, vector<128x128xf32>
        tpu.vector_store %arg6[%c0_30, %c0_31], %51 {strides = array<i32>} : memref<128x128xf32, #tpu.memory_space<vmem>>, vector<128x128xf32>,
      } else {
      }
      %c1_i32_24 = arith.constant 1 : i32
      %45 = arith.cmpi ne, %arg0, %c1_i32_24 : i32
      %46 = arith.extui %45 : i1 to i32
      %c0_i32_25 = arith.constant 0 : i32
      %47 = arith.cmpi ne, %46, %c0_i32_25 : i32
      scf.if %47 {
        %c0_26 = arith.constant 0 : index
        %c0_27 = arith.constant 0 : index
        %48 = vector.load %arg8[%c0_26, %c0_27] : memref<128x128xf32, #tpu.memory_space<vmem>>, vector<128x128xf32>
        %49 = arith.truncf %48 : vector<128x128xf32> to vector<128x128xbf16>
        %c128_i32_28 = arith.constant 128 : i32
        %50 = arith.muli %arg1, %c128_i32_28 : i32
        %51 = tpu.assume_multiple %50, 128 : i32
        %c2_i32_29 = arith.constant 2 : i32
        %c0_i32_30 = arith.constant 0 : i32
        %52 = arith.cmpi eq, %c2_i32_29, %c0_i32_30 : i32
        %c1_i32_31 = arith.constant 1 : i32
        %53 = arith.select %52, %c1_i32_31, %c2_i32_29 : i32
        %54 = arith.remsi %arg0, %53 : i32
        %c0_i32_32 = arith.constant 0 : i32
        %55 = arith.cmpi ne, %54, %c0_i32_32 : i32
        %c0_i32_33 = arith.constant 0 : i32
        %56 = arith.cmpi slt, %54, %c0_i32_33 : i32
        %c0_i32_34 = arith.constant 0 : i32
        %57 = arith.cmpi slt, %53, %c0_i32_34 : i32
        %58 = arith.xori %56, %57 : i1
        %59 = arith.andi %58, %55 : i1
        %60 = arith.addi %54, %53 : i32
        %61 = arith.select %59, %60, %54 : i32
        %c0_i32_35 = arith.constant 0 : i32
        %62 = arith.cmpi eq, %61, %c0_i32_35 : i32
        %63 = arith.extui %62 : i1 to i32
        %c0_i32_36 = arith.constant 0 : i32
        %64 = arith.cmpi ne, %63, %c0_i32_36 : i32
        scf.if %64 {
          %c0_45 = arith.constant 0 : index
          %78 = arith.index_cast %51 : i32 to index
          %c0_46 = arith.constant 0 : index
          %79 = vector.load %arg7[%c0_45, %78, %c0_46] : memref<2x128x128xbf16, #tpu.memory_space<vmem>>, vector<1x128x128xbf16>
          %80 = vector.shape_cast %79 : vector<1x128x128xbf16> to vector<128x128xbf16>
          %81 = vector.shape_cast %49 : vector<128x128xbf16> to vector<1x128x128xbf16>
          tpu.vector_store %arg7[%c0_45, %78, %c0_46], %81 {strides = array<i32>} : memref<2x128x128xbf16, #tpu.memory_space<vmem>>, vector<1x128x128xbf16>,
        } else {
        }
        %c2_i32_37 = arith.constant 2 : i32
        %c0_i32_38 = arith.constant 0 : i32
        %65 = arith.cmpi eq, %c2_i32_37, %c0_i32_38 : i32
        %c1_i32_39 = arith.constant 1 : i32
        %66 = arith.select %65, %c1_i32_39, %c2_i32_37 : i32
        %67 = arith.remsi %arg0, %66 : i32
        %c0_i32_40 = arith.constant 0 : i32
        %68 = arith.cmpi ne, %67, %c0_i32_40 : i32
        %c0_i32_41 = arith.constant 0 : i32
        %69 = arith.cmpi slt, %67, %c0_i32_41 : i32
        %c0_i32_42 = arith.constant 0 : i32
        %70 = arith.cmpi slt, %66, %c0_i32_42 : i32
        %71 = arith.xori %69, %70 : i1
        %72 = arith.andi %71, %68 : i1
        %73 = arith.addi %67, %66 : i32
        %74 = arith.select %72, %73, %67 : i32
        %c1_i32_43 = arith.constant 1 : i32
        %75 = arith.cmpi eq, %74, %c1_i32_43 : i32
        %76 = arith.extui %75 : i1 to i32
        %c0_i32_44 = arith.constant 0 : i32
        %77 = arith.cmpi ne, %76, %c0_i32_44 : i32
        scf.if %77 {
          %c1 = arith.constant 1 : index
          %78 = arith.index_cast %51 : i32 to index
          %c0_45 = arith.constant 0 : index
          %79 = vector.load %arg7[%c1, %78, %c0_45] : memref<2x128x128xbf16, #tpu.memory_space<vmem>>, vector<1x128x128xbf16>
          %80 = vector.shape_cast %79 : vector<1x128x128xbf16> to vector<128x128xbf16>
          %81 = vector.shape_cast %49 : vector<128x128xbf16> to vector<1x128x128xbf16>
          tpu.vector_store %arg7[%c1, %78, %c0_45], %81 {strides = array<i32>} : memref<2x128x128xbf16, #tpu.memory_space<vmem>>, vector<1x128x128xbf16>,
        } else {
        }
      } else {
      }
    } else {
    }
    return
  }
  func.func @transform_0(%arg0: i32, %arg1: i32, %arg2: i32) -> (i32, i32) {
    %c0_i32 = arith.constant 0 : i32
    return %arg1, %arg2 : i32, i32
  }
  func.func @transform_1(%arg0: i32, %arg1: i32, %arg2: i32) -> (i32, i32) {
    %c0_i32 = arith.constant 0 : i32
    %0 = arith.cmpi eq, %arg0, %c0_i32 : i32
    %c0_i32_0 = arith.constant 0 : i32
    %1 = arith.select %0, %arg2, %c0_i32_0 : i32
    %c0_i32_1 = arith.constant 0 : i32
    %c0_i32_2 = arith.constant 0 : i32
    return %1, %c0_i32_1 : i32, i32
  }
  func.func @transform_2(%arg0: i32, %arg1: i32, %arg2: i32) -> (i32, i32) {
    %c0_i32 = arith.constant 0 : i32
    %c0_i32_0 = arith.constant 0 : i32
    %c0_i32_1 = arith.constant 0 : i32
    return %c0_i32, %c0_i32_0 : i32, i32
  }
  func.func @transform_3(%arg0: i32, %arg1: i32, %arg2: i32) -> (i32, i32) {
    %c1_i32 = arith.constant 1 : i32
    %0 = arith.cmpi eq, %arg0, %c1_i32 : i32
    %c0_i32 = arith.constant 0 : i32
    %1 = arith.select %0, %arg1, %c0_i32 : i32
    %c0_i32_0 = arith.constant 0 : i32
    %c0_i32_1 = arith.constant 0 : i32
    return %1, %c0_i32_0 : i32, i32
  }
}

</mosaic_0001>

<bundles_post_ra>
// kernel: sgc_forward_pallas.2
= control target key start
LH: loop header
LB: loop body
LE: loop exit
PB: predicated region body
PF: predicated region fallthrough
CT: control target
= control target key end

     0   :  { %s630_s1 = inlined_call_operand.vmem [shape: f32[128,128], index: 1, kind: input, shape index: {}]   ;;  %s631_s2 = inlined_call_operand.vmem [shape: f32[1,128], index: 2, kind: input, shape index: {}]   ;;  %s632_s0 = inlined_call_operand.vmem [shape: f32[128,128], index: 0, kind: input, shape index: {}]   ;;  %s633_s3 = inlined_call_operand.vmem [shape: bf16[128,128], index: 3, kind: output, shape index: {}]  }
   0x1   :  { %v30_v0 = vld [vmem:[%s630_s1] sm:$0xff]  ;;  %v31_v1 = vld [vmem:[%s630_s1 + $0x8] sm:$0xff]  ;;  %v32_v2 = vld [vmem:[%s630_s1 + $0x10] sm:$0xff] }
   0x2   :  { %v442_v3 = vpack.c.bf16 %v31_v1, %v30_v0  ;;  %v33_v4 = vld [vmem:[%s630_s1 + $0x18] sm:$0xff]  ;;  %v34_v6 = vld [vmem:[%s630_s1 + $0x20] sm:$0xff]  ;;  %v35_v7 = vld [vmem:[%s630_s1 + $0x28] sm:$0xff] }
   0x3   :  { %v446_v5 = vpack.c.bf16 %v33_v4, %v32_v2  ;;  %v450_v8 = vpack.c.bf16 %v35_v7, %v34_v6  ;;  %v14_v9 = vld [vmem:[%s632_s0] sm:$0xff]  ;;  %v36_v11 = vld [vmem:[%s630_s1 + $0x30] sm:$0xff]  ;;  %v37_v12 = vld [vmem:[%s630_s1 + $0x38] sm:$0xff] }
   0x4   :  { %443 = vmatprep.subr.bf16.mxu0 %v442_v3  ;;  %474 = vmatprep.subr.bf16.mxu1 %v442_v3  ;;  %v22_v10 = vld [vmem:[%s632_s0 + $0x40] sm:$0xff]  ;;  %v454_v13 = vpack.c.bf16 %v37_v12, %v36_v11  ;;  %v39_v15 = vld [vmem:[%s630_s1 + $0x48] sm:$0xff]  ;;  %v40_v17 = vld [vmem:[%s630_s1 + $0x50] sm:$0xff] }
   0x5   :  { %445 = vmatpush3.bf16.msra.mxu0 %v442_v3  ;;  %482 = vmatpush3.bf16.msra.mxu1 %v442_v3  ;;  %v38_v14 = vld [vmem:[%s630_s1 + $0x40] sm:$0xff]  ;;  %v41_v18 = vld [vmem:[%s630_s1 + $0x58] sm:$0xff]  ;;  %v43_v21 = vld [vmem:[%s630_s1 + $0x68] sm:$0xff] }
   0x6   :  { %447 = vmatprep.subr.bf16.mxu0 %v446_v5  ;;  %475 = vmatprep.subr.bf16.mxu1 %v446_v5  ;;  %v458_v16 = vpack.c.bf16 %v39_v15, %v38_v14  ;;  %v462_v19 = vpack.c.bf16 %v41_v18, %v40_v17  ;;  %v42_v20 = vld [vmem:[%s630_s1 + $0x60] sm:$0xff]  ;;  %v44_v23 = vld [vmem:[%s630_s1 + $0x70] sm:$0xff]  ;;  %v45_v24 = vld [vmem:[%s630_s1 + $0x78] sm:$0xff] }
   0x7   :  { %418 = vmatprep.mubr.f32.mxu0 %v14_v9  ;;  %430 = vmatprep.mubr.f32.mxu1 %v22_v10  ;;  %v466_v22 = vpack.c.bf16 %v43_v21, %v42_v20  ;;  %v470_v25 = vpack.c.bf16 %v45_v24, %v44_v23  ;;  %v15_v26 = vld [vmem:[%s632_s0 + $0x8] sm:$0xff]  ;;  %v16_v28 = vld [vmem:[%s632_s0 + $0x10] sm:$0xff]  ;;  %v17_v30 = vld [vmem:[%s632_s0 + $0x18] sm:$0xff] }
   0x8   :  { %v23_v27 = vld [vmem:[%s632_s0 + $0x48] sm:$0xff]  ;;  %v24_v29 = vld [vmem:[%s632_s0 + $0x50] sm:$0xff]  ;;  %v25_v31 = vld [vmem:[%s632_s0 + $0x58] sm:$0xff] }
   0x9   :  { %449 = vmatpush3.bf16.msra.mxu0 %v446_v5  ;;  %483 = vmatpush3.bf16.msra.mxu1 %v446_v5  ;;  %v18_v32 = vld [vmem:[%s632_s0 + $0x20] sm:$0xff]  ;;  %v19_v34 = vld [vmem:[%s632_s0 + $0x28] sm:$0xff]  ;;  %v20_v36 = vld [vmem:[%s632_s0 + $0x30] sm:$0xff] }
   0xa   :  { %451 = vmatprep.subr.bf16.mxu0 %v450_v8  ;;  %476 = vmatprep.subr.bf16.mxu1 %v450_v8  ;;  %v26_v33 = vld [vmem:[%s632_s0 + $0x60] sm:$0xff]  ;;  %v27_v35 = vld [vmem:[%s632_s0 + $0x68] sm:$0xff]  ;;  %v28_v37 = vld [vmem:[%s632_s0 + $0x70] sm:$0xff] }
   0xb   :  { %v21_v38 = vld [vmem:[%s632_s0 + $0x38] sm:$0xff] }
   0xc   :  { %v29_v39 = vld [vmem:[%s632_s0 + $0x78] sm:$0xff] }
   0xd   :  { %453 = vmatpush3.bf16.msra.mxu0 %v450_v8  ;;  %484 = vmatpush3.bf16.msra.mxu1 %v450_v8 }
   0xe   :  { %455 = vmatprep.subr.bf16.mxu0 %v454_v13  ;;  %477 = vmatprep.subr.bf16.mxu1 %v454_v13 }
  0x11   :  { %457 = vmatpush3.bf16.msra.mxu0 %v454_v13  ;;  %485 = vmatpush3.bf16.msra.mxu1 %v454_v13 }
  0x12   :  { %459 = vmatprep.subr.bf16.mxu0 %v458_v16  ;;  %478 = vmatprep.subr.bf16.mxu1 %v458_v16 }
  0x15   :  { %461 = vmatpush3.bf16.msra.mxu0 %v458_v16  ;;  %486 = vmatpush3.bf16.msra.mxu1 %v458_v16 }
  0x16   :  { %463 = vmatprep.subr.bf16.mxu0 %v462_v19  ;;  %479 = vmatprep.subr.bf16.mxu1 %v462_v19 }
  0x19   :  { %465 = vmatpush3.bf16.msra.mxu0 %v462_v19  ;;  %487 = vmatpush3.bf16.msra.mxu1 %v462_v19 }
  0x1a   :  { %467 = vmatprep.subr.bf16.mxu0 %v466_v22  ;;  %480 = vmatprep.subr.bf16.mxu1 %v466_v22 }
  0x1d   :  { %469 = vmatpush3.bf16.msra.mxu0 %v466_v22  ;;  %488 = vmatpush3.bf16.msra.mxu1 %v466_v22 }
  0x1e   :  { %471 = vmatprep.subr.bf16.mxu0 %v470_v25  ;;  %481 = vmatprep.subr.bf16.mxu1 %v470_v25 }
  0x21   :  { %473 = vmatpush3.bf16.msra.mxu0 %v470_v25  ;;  %489 = vmatpush3.bf16.msra.mxu1 %v470_v25 }
  0x24   :  { %419 = vmatmul.mubr.f32.vlgmr.msra.gmra.mrb[0].mxu0 %v15_v26  ;;  %431 = vmatmul.mubr.f32.vlgmr.msra.gmra.mrb[0].mxu1 %v23_v27 }
  0x25   :  { %421 = vmatprep.mubr.f32.mxu0 %v16_v28  ;;  %433 = vmatprep.mubr.f32.mxu1 %v24_v29 }
  0x28   :  { %422 = vmatmul.mubr.f32.gmra.mrb[2].mxu0 %v17_v30  ;;  %434 = vmatmul.mubr.f32.gmra.mrb[2].mxu1 %v25_v31 }
  0x29   :  { %424 = vmatprep.mubr.f32.mxu0 %v18_v32  ;;  %436 = vmatprep.mubr.f32.mxu1 %v26_v33 }
  0x2c   :  { %425 = vmatmul.mubr.f32.gmra.mrb[4].mxu0 %v19_v34  ;;  %437 = vmatmul.mubr.f32.gmra.mrb[4].mxu1 %v27_v35 }
  0x2d   :  { %427 = vmatprep.mubr.f32.mxu0 %v20_v36  ;;  %439 = vmatprep.mubr.f32.mxu1 %v28_v37 }
  0x30   :  { %428 = vmatmul.mubr.f32.gmra.mrb[6].mxu0 %v21_v38  ;;  %440 = vmatmul.mubr.f32.gmra.mrb[6].mxu1 %v29_v39 }
  0xf7   :  { %v420_v40 = vpop.f32.mrb[0].mxu0  ;;  %v432_v41 = vpop.f32.mrb[0].mxu1 }
  0xf8   :  { %v112_v42 = vpop.f32.mrb[1].mxu0  ;;  %v152_v43 = vpop.f32.mrb[1].mxu1 }
  0xf9   :  { %v310_v44 = vpack.c.bf16 %v420_v40, %v112_v42  ;;  %v330_v45 = vpack.c.bf16 %v432_v41, %v152_v43 }
  0xfb   :  { %311 = vst [vmem:[%s633_s3] sm:$0xff] %v310_v44   ;;  %350 = vst [vmem:[%s633_s3 + $0x20] sm:$0xff] %v330_v45   ;;  %v423_v46 = vpop.f32.mrb[2].mxu0  ;;  %v435_v47 = vpop.f32.mrb[2].mxu1 }
  0xfc   :  { %v122_v48 = vpop.f32.mrb[3].mxu0  ;;  %v162_v49 = vpop.f32.mrb[3].mxu1 }
  0xfd   :  { %v315_v50 = vpack.c.bf16 %v423_v46, %v122_v48  ;;  %v335_v51 = vpack.c.bf16 %v435_v47, %v162_v49 }
  0xff   :  { %347 = vst [vmem:[%s633_s3 + $0x8] sm:$0xff] %v315_v50   ;;  %351 = vst [vmem:[%s633_s3 + $0x28] sm:$0xff] %v335_v51   ;;  %v426_v52 = vpop.f32.mrb[4].mxu0  ;;  %v438_v53 = vpop.f32.mrb[4].mxu1 }
 0x100   :  { %v132_v54 = vpop.f32.mrb[5].mxu0  ;;  %v172_v55 = vpop.f32.mrb[5].mxu1 }
 0x101   :  { %v320_v56 = vpack.c.bf16 %v426_v52, %v132_v54  ;;  %v340_v57 = vpack.c.bf16 %v438_v53, %v172_v55 }
 0x103   :  { %348 = vst [vmem:[%s633_s3 + $0x10] sm:$0xff] %v320_v56   ;;  %352 = vst [vmem:[%s633_s3 + $0x30] sm:$0xff] %v340_v57   ;;  %v429_v58 = vpop.f32.mrb[6].mxu0  ;;  %v441_v59 = vpop.f32.mrb[6].mxu1 }
 0x104   :  { %v142_v60 = vpop.f32.mrb[7].mxu0  ;;  %v182_v61 = vpop.f32.mrb[7].mxu1 }
 0x105   :  { %v325_v62 = vpack.c.bf16 %v429_v58, %v142_v60  ;;  %v345_v63 = vpack.c.bf16 %v441_v59, %v182_v61 }
 0x107   :  { %349 = vst [vmem:[%s633_s3 + $0x18] sm:$0xff] %v325_v62   ;;  %353 = vst [vmem:[%s633_s3 + $0x38] sm:$0xff] %v345_v63  }

// kernel: sgc_forward_pallas.3
= control target key start
LH: loop header
LB: loop body
LE: loop exit
PB: predicated region body
PF: predicated region fallthrough
CT: control target
= control target key end

     0   :  { %s1545_s12 = smov 0   ;;  %s1547_s13 = smov 0   ;;  %s1794_s0 = inlined_call_operand.vmem [shape: bf16[128,128], index: 0, kind: input, shape index: {}]   ;;  %s1795_s1 = inlined_call_operand.vmem [shape: bf16[128,128], index: 1, kind: input, shape index: {}]   ;;  %s1796_s2 = inlined_call_operand.vmem [shape: f32[1,128], index: 2, kind: input, shape index: {}]   ;;  %s1797_s3 = inlined_call_operand.vmem [shape: f32[128,128], index: 3, kind: output, shape index: {}]  }
   0x1   :  { %s1549_s14 = smov 0  }
   0x2 LB: > { %s32_s15 = sadd.s32 1, %s1518_s13  ;;  %p1213_p0 = scmp.ge.s32.totalorder %s1522_s14, 1  ;;  %s1522_s14 = sphi %s1549_s14, %s13_s14   ;;  %s1518_s13 = sphi %s1547_s13, %s1799_s13   ;;  %s1514_s12 = sphi %s1545_s12, %s1798_s12  }
   0x3   : > { %p34_p1 = scmp.ge.s32.totalorder %s32_s15, 2  ;;  %p185_p2 = scmp.lt.s32.totalorder %s1522_s14, 3 }
   0x5   : > { %s1801_s15 = smov (%p34_p1, %s32_s15), 0  ;;  %p186_p3 = pnand %p1213_p0, %p185_p2 }
   0x6   : > { %v1568_v0 = vld [vmem:[%s1794_s0] sm:$0xf] (!%p186_p3)  ;;  %v1573_v1 = vld [vmem:[%s1794_s0 + $0x4] sm:$0xf] (!%p186_p3)  ;;  %v1524_v2 = vmov (!%p186_p3), 0.0   ;;  %p1214_p4 = scmp.ne.s32.totalorder (!%p186_p3), %s1514_s12, 0 }
   0x7   : > { %189 = sbr.rel (%p186_p3) target bundleno = 843 (0x34b), region = 32  ;;  %255 = vst [vmem:[#allocation3] sm:$0xff] (!%p186_p3), %v1524_v2  ;;  %256 = vst [vmem:[#allocation3 + $0x8] sm:$0xff] (!%p186_p3), %v1524_v2  ;;  %v1578_v3 = vld [vmem:[%s1794_s0 + $0x8] sm:$0xf] (!%p186_p3) }
   0x8   : > { %257 = vst [vmem:[#allocation3 + $0x10] sm:$0xff] (!%p186_p3), %v1524_v2  ;;  %258 = vst [vmem:[#allocation3 + $0x18] sm:$0xff] (!%p186_p3), %v1524_v2  ;;  %v1583_v4 = vld [vmem:[%s1794_s0 + $0xc] sm:$0xf] (!%p186_p3)  ;;  %v1588_v5 = vld [vmem:[%s1794_s0 + $0x10] sm:$0xf] (!%p186_p3) }
   0x9   : > { %259 = vst [vmem:[#allocation3 + $0x20] sm:$0xff] (!%p186_p3), %v1524_v2  ;;  %260 = vst [vmem:[#allocation3 + $0x28] sm:$0xff] (!%p186_p3), %v1524_v2  ;;  %v1593_v6 = vld [vmem:[%s1794_s0 + $0x14] sm:$0xf] (!%p186_p3)  ;;  %v1598_v7 = vld [vmem:[%s1794_s0 + $0x18] sm:$0xf] (!%p186_p3) }
   0xa   : > { %261 = vst [vmem:[#allocation3 + $0x30] sm:$0xff] (!%p186_p3), %v1524_v2  ;;  %262 = vst [vmem:[#allocation3 + $0x38] sm:$0xff] (!%p186_p3), %v1524_v2  ;;  %v1603_v8 = vld [vmem:[%s1794_s0 + $0x1c] sm:$0xf] (!%p186_p3)  ;;  %v1608_v9 = vld [vmem:[%s1794_s0 + $0x20] sm:$0xf] (!%p186_p3) }
   0xb   : > { %263 = vst [vmem:[#allocation3 + $0x40] sm:$0xff] (!%p186_p3), %v1524_v2  ;;  %264 = vst [vmem:[#allocation3 + $0x48] sm:$0xff] (!%p186_p3), %v1524_v2  ;;  %v1613_v10 = vld [vmem:[%s1794_s0 + $0x24] sm:$0xf] (!%p186_p3)  ;;  %v1618_v11 = vld [vmem:[%s1794_s0 + $0x28] sm:$0xf] (!%p186_p3) }
   0xc   : > { %265 = vst [vmem:[#allocation3 + $0x50] sm:$0xff] (!%p186_p3), %v1524_v2  ;;  %266 = vst [vmem:[#allocation3 + $0x58] sm:$0xff] (!%p186_p3), %v1524_v2  ;;  %v1623_v12 = vld [vmem:[%s1794_s0 + $0x2c] sm:$0xf] (!%p186_p3)  ;;  %v1628_v13 = vld [vmem:[%s1794_s0 + $0x30] sm:$0xf] (!%p186_p3) }
   0xd   : > { %267 = vst [vmem:[#allocation3 + $0x60] sm:$0xff] (!%p186_p3), %v1524_v2  ;;  %268 = vst [vmem:[#allocation3 + $0x68] sm:$0xff] (!%p186_p3), %v1524_v2  ;;  %v1633_v14 = vld [vmem:[%s1794_s0 + $0x34] sm:$0xf] (!%p186_p3)  ;;  %v1638_v15 = vld [vmem:[%s1794_s0 + $0x38] sm:$0xf] (!%p186_p3) }
   0xe   : > { %269 = vst [vmem:[#allocation3 + $0x70] sm:$0xff] %v1524_v2  ;;  %270 = vst [vmem:[#allocation3 + $0x78] sm:$0xff] %v1524_v2  ;;  %v1643_v16 = vld [vmem:[%s1794_s0 + $0x3c] sm:$0xf]  ;;  %291 = sbr.rel (%p1214_p4) target bundleno = 273 (0x111), region = 40  ;;  %v1492_v17 = vld [vmem:[%s1795_s1] sm:$0xff] (!%p1214_p4)   ;;  %v1215_v19 = vcombine.low (!%p1214_p4), %v1568_v0, %v1573_v1  ;;  %v1219_v20 = vcombine.low (!%p1214_p4), %v1608_v9, %v1613_v10  ;;  %v1216_v27 = vcombine.low (!%p1214_p4), %v1578_v3, %v1583_v4 }
   0xf   : > { %v1493_v18 = vld [vmem:[%s1795_s1 + $0x8] sm:$0xff] (!%p1214_p4)   ;;  %1323 = vmatprep.subr.bf16.mxu0 (!%p1214_p4), %v1492_v17  ;;  %1419 = vmatprep.subr.bf16.mxu1 (!%p1214_p4), %v1492_v17  ;;  %v1494_v21 = vld [vmem:[%s1795_s1 + $0x10] sm:$0xff] (!%p1214_p4)   ;;  %v1495_v22 = vld [vmem:[%s1795_s1 + $0x18] sm:$0xff] (!%p1214_p4)   ;;  %v1220_v28 = vcombine.low (!%p1214_p4), %v1618_v11, %v1623_v12  ;;  %v1217_v29 = vcombine.low (!%p1214_p4), %v1588_v5, %v1593_v6  ;;  %v1221_v30 = vcombine.low (!%p1214_p4), %v1628_v13, %v1633_v14 }
  0x10   : > { %1324 = vmatpush3.bf16.msra.mxu0 (!%p1214_p4), %v1492_v17  ;;  %1427 = vmatpush3.bf16.msra.mxu1 (!%p1214_p4), %v1492_v17  ;;  %v1496_v23 = vld [vmem:[%s1795_s1 + $0x20] sm:$0xff] (!%p1214_p4)   ;;  %v1497_v24 = vld [vmem:[%s1795_s1 + $0x28] sm:$0xff] (!%p1214_p4)   ;;  %v1498_v25 = vld [vmem:[%s1795_s1 + $0x30] sm:$0xff] (!%p1214_p4)   ;;  %v1218_v31 = vcombine.low (!%p1214_p4), %v1598_v7, %v1603_v8  ;;  %v1222_v32 = vcombine.low (!%p1214_p4), %v1638_v15, %v1643_v16 }
  0x11   : > { %1325 = vmatprep.subr.bf16.mxu0 (!%p1214_p4), %v1493_v18  ;;  %1420 = vmatprep.subr.bf16.mxu1 (!%p1214_p4), %v1493_v18  ;;  %v1499_v26 = vld [vmem:[%s1795_s1 + $0x38] sm:$0xff] (!%p1214_p4)   ;;  %v310_v33 = vld [vmem:[#allocation3 + $0x10] sm:$0xff] (!%p1214_p4)  ;;  %v308_v35 = vld [vmem:[#allocation3] sm:$0xff] (!%p1214_p4) }
  0x12   : > { %1339 = vmatprep.mubr.bf16.mxu0 (!%p1214_p4), %v1215_v19  ;;  %1347 = vmatprep.mubr.bf16.mxu1 (!%p1214_p4), %v1219_v20  ;;  %v316_v36 = vld [vmem:[#allocation3 + $0x40] sm:$0xff] (!%p1214_p4)  ;;  %v311_v39 = vld [vmem:[#allocation3 + $0x18] sm:$0xff] (!%p1214_p4)  ;;  %v309_v45 = vld [vmem:[#allocation3 + $0x8] sm:$0xff] (!%p1214_p4) }
  0x13   : > { %v318_v34 = vld [vmem:[#allocation3 + $0x50] sm:$0xff] (!%p1214_p4)  ;;  %v319_v40 = vld [vmem:[#allocation3 + $0x58] sm:$0xff] (!%p1214_p4)  ;;  %v317_v46 = vld [vmem:[#allocation3 + $0x48] sm:$0xff] (!%p1214_p4) }
  0x14   : > { %1326 = vmatpush3.bf16.msra.mxu0 (!%p1214_p4), %v1493_v18  ;;  %1428 = vmatpush3.bf16.msra.mxu1 (!%p1214_p4), %v1493_v18  ;;  %v314_v57 = vld [vmem:[#allocation3 + $0x30] sm:$0xff] (!%p1214_p4)  ;;  %v312_v59 = vld [vmem:[#allocation3 + $0x20] sm:$0xff] (!%p1214_p4)  ;;  %v315_v63 = vld [vmem:[#allocation3 + $0x38] sm:$0xff] (!%p1214_p4) }
  0x15   : > { %1327 = vmatprep.subr.bf16.mxu0 %v1494_v21  ;;  %1421 = vmatprep.subr.bf16.mxu1 %v1494_v21  ;;  %v322_v58 = vld [vmem:[#allocation3 + $0x70] sm:$0xff]  ;;  %v320_v60 = vld [vmem:[#allocation3 + $0x60] sm:$0xff]  ;;  %v323_v2 = vld [vmem:[#allocation3 + $0x78] sm:$0xff] }
  0x18   : > { %1328 = vmatpush3.bf16.msra.mxu0 %v1494_v21  ;;  %1429 = vmatpush3.bf16.msra.mxu1 %v1494_v21  ;;  %v313_v21 = vld [vmem:[#allocation3 + $0x28] sm:$0xff] }
  0x19   : > { %1329 = vmatprep.subr.bf16.mxu0 %v1495_v22  ;;  %1422 = vmatprep.subr.bf16.mxu1 %v1495_v22 }
  0x1c   : > { %1330 = vmatpush3.bf16.msra.mxu0 %v1495_v22  ;;  %1430 = vmatpush3.bf16.msra.mxu1 %v1495_v22  ;;  %v321_v22 = vld [vmem:[#allocation3 + $0x68] sm:$0xff] }
  0x1d   : > { %1331 = vmatprep.subr.bf16.mxu0 %v1496_v23  ;;  %1423 = vmatprep.subr.bf16.mxu1 %v1496_v23 }
  0x20   : > { %1332 = vmatpush3.bf16.msra.mxu0 %v1496_v23  ;;  %1431 = vmatpush3.bf16.msra.mxu1 %v1496_v23 }
  0x21   : > { %1333 = vmatprep.subr.bf16.mxu0 %v1497_v24  ;;  %1424 = vmatprep.subr.bf16.mxu1 %v1497_v24 }
  0x24   : > { %1334 = vmatpush3.bf16.msra.mxu0 %v1497_v24  ;;  %1432 = vmatpush3.bf16.msra.mxu1 %v1497_v24 }
  0x25   : > { %1335 = vmatprep.subr.bf16.mxu0 %v1498_v25  ;;  %1425 = vmatprep.subr.bf16.mxu1 %v1498_v25 }
  0x28   : > { %1336 = vmatpush3.bf16.msra.mxu0 %v1498_v25  ;;  %1433 = vmatpush3.bf16.msra.mxu1 %v1498_v25 }
  0x29   : > { %1337 = vmatprep.subr.bf16.mxu0 %v1499_v26  ;;  %1426 = vmatprep.subr.bf16.mxu1 %v1499_v26 }
  0x2c   : > { %1338 = vmatpush3.bf16.msra.mxu0 %v1499_v26  ;;  %1434 = vmatpush3.bf16.msra.mxu1 %v1499_v26 }
  0x2f   : > { %1340 = vmatmul.mubr.bf16.vlgmr.msra.gmra.mrb[0].mxu0 %v1216_v27  ;;  %1348 = vmatmul.mubr.bf16.vlgmr.msra.gmra.mrb[0].mxu1 %v1220_v28 }
  0x30   : > { %1343 = vmatprep.mubr.bf16.mxu0 %v1217_v29  ;;  %1351 = vmatprep.mubr.bf16.mxu1 %v1221_v30 }
  0x37   : > { %1344 = vmatmul.mubr.bf16.gmra.mrb[4].mxu0 %v1218_v31  ;;  %1352 = vmatmul.mubr.bf16.gmra.mrb[4].mxu1 %v1222_v32 }
 0x102   : > { %v1341_v37 = vpop.f32.mrb[0].mxu0  ;;  %v1349_v38 = vpop.f32.mrb[0].mxu1 }
 0x103   : > { %v519_v41 = vadd.f32 %v1341_v37, %v310_v33  ;;  %v527_v42 = vadd.f32 %v1349_v38, %v318_v34  ;;  %v454_v43 = vpop.f32.mrb[1].mxu0  ;;  %v486_v44 = vpop.f32.mrb[1].mxu1 }
 0x104   : > { %v517_v47 = vadd.f32 %v454_v43, %v308_v35  ;;  %v525_v48 = vadd.f32 %v486_v44, %v316_v36  ;;  %v1342_v49 = vpop.f32.mrb[2].mxu0  ;;  %v1350_v50 = vpop.f32.mrb[2].mxu1 }
 0x105   : > { %535 = vst [vmem:[#allocation3 + $0x10] sm:$0xff] %v519_v41  ;;  %543 = vst [vmem:[#allocation3 + $0x50] sm:$0xff] %v527_v42  ;;  %v520_v51 = vadd.f32 %v1342_v49, %v311_v39  ;;  %v528_v52 = vadd.f32 %v1350_v50, %v319_v40  ;;  %v457_v53 = vpop.f32.mrb[3].mxu0  ;;  %v489_v54 = vpop.f32.mrb[3].mxu1 }
 0x106   : > { %533 = vst [vmem:[#allocation3] sm:$0xff] %v517_v47  ;;  %541 = vst [vmem:[#allocation3 + $0x40] sm:$0xff] %v525_v48  ;;  %v518_v55 = vadd.f32 %v457_v53, %v309_v45  ;;  %v526_v56 = vadd.f32 %v489_v54, %v317_v46 }
 0x107   : > { %536 = vst [vmem:[#allocation3 + $0x18] sm:$0xff] %v520_v51  ;;  %544 = vst [vmem:[#allocation3 + $0x58] sm:$0xff] %v528_v52 }
 0x108   : > { %534 = vst [vmem:[#allocation3 + $0x8] sm:$0xff] %v518_v55  ;;  %542 = vst [vmem:[#allocation3 + $0x48] sm:$0xff] %v526_v56 }
 0x10a   : > { %v1345_v61 = vpop.f32.mrb[4].mxu0  ;;  %v1353_v62 = vpop.f32.mrb[4].mxu1 }
 0x10b   : > { %v523_v17 = vadd.f32 %v1345_v61, %v314_v57  ;;  %v531_v18 = vadd.f32 %v1353_v62, %v322_v58  ;;  %v470_v19 = vpop.f32.mrb[5].mxu0  ;;  %v502_v20 = vpop.f32.mrb[5].mxu1 }
 0x10c   : > { %v521_v23 = vadd.f32 %v470_v19, %v312_v59  ;;  %v529_v24 = vadd.f32 %v502_v20, %v320_v60  ;;  %v1346_v25 = vpop.f32.mrb[6].mxu0  ;;  %v1354_v26 = vpop.f32.mrb[6].mxu1 }
 0x10d   : > { %539 = vst [vmem:[#allocation3 + $0x30] sm:$0xff] %v523_v17  ;;  %547 = vst [vmem:[#allocation3 + $0x70] sm:$0xff] %v531_v18  ;;  %v524_v27 = vadd.f32 %v1346_v25, %v315_v63  ;;  %v532_v28 = vadd.f32 %v1354_v26, %v323_v2  ;;  %v473_v29 = vpop.f32.mrb[7].mxu0  ;;  %v505_v30 = vpop.f32.mrb[7].mxu1 }
 0x10e   : > { %537 = vst [vmem:[#allocation3 + $0x20] sm:$0xff] %v521_v23  ;;  %545 = vst [vmem:[#allocation3 + $0x60] sm:$0xff] %v529_v24  ;;  %v522_v31 = vadd.f32 %v473_v29, %v313_v21  ;;  %v530_v32 = vadd.f32 %v505_v30, %v321_v22 }
 0x10f   : > { %540 = vst [vmem:[#allocation3 + $0x38] sm:$0xff] %v524_v27  ;;  %548 = vst [vmem:[#allocation3 + $0x78] sm:$0xff] %v532_v28 }
 0x110   : > { %538 = vst [vmem:[#allocation3 + $0x28] sm:$0xff] %v522_v31  ;;  %546 = vst [vmem:[#allocation3 + $0x68] sm:$0xff] %v530_v32 }
 0x111 PF: > { %p550_p5 = scmp.lt.s32.totalorder %s1514_s12, 0  ;;  %s551_s18 = ssub.s32 0, %s1514_s12 }
 0x112   : > { %s1231_s19 = smin.u32 %s1514_s12, %s551_s18  ;;  %p549_p7 = scmp.gt.s32.totalorder %s1514_s12, 0 }
 0x113   : > { %s553_s20 = sand.u32 1, %s1231_s19  }
 0x114   : > { %s554_s21 = ssub.s32 0, %s553_s20 }
 0x115   : > { %s1803_s21 = smov (!%p550_p5, %s554_s21), %s553_s20 }
 0x116   : > { %p1233_p6 = scmp.lt.s32.totalorder %s1803_s21, 0  ;;  %s560_s22 = sadd.s32 2, %s1803_s21 }
 0x118   : > { %s1805_s22 = smov (!%p1233_p6, %s560_s22), %s1803_s21 }
 0x119   : > { %p562_p8 = scmp.eq.s32.totalorder %s1805_s22, 1 }
 0x11b   : > { %p563_p9 = pnand %p562_p8, %p549_p7 }
 0x11c   : > { %v571_v33 = vld [vmem:[#allocation2] sm:$0xff] (!%p563_p9)  ;;  %v572_v34 = vld [vmem:[#allocation2 + $0x8] sm:$0xff] (!%p563_p9)  ;;  %v1234_v35 = vcombine.low (!%p563_p9), %v1568_v0, %v1573_v1  ;;  %v1238_v36 = vcombine.low (!%p563_p9), %v1608_v9, %v1613_v10  ;;  %v573_v37 = vld [vmem:[#allocation2 + $0x10] sm:$0xff] (!%p563_p9)  ;;  %v1235_v43 = vcombine.low (!%p563_p9), %v1578_v3, %v1583_v4  ;;  %v1239_v44 = vcombine.low (!%p563_p9), %v1618_v11, %v1623_v12 }
 0x11d   : > { %566 = sbr.rel (%p563_p9) target bundleno = 543 (0x21f), region = 44  ;;  %1355 = vmatprep.subr.bf16.mxu0 (!%p563_p9), %v571_v33  ;;  %1435 = vmatprep.subr.bf16.mxu1 (!%p563_p9), %v571_v33  ;;  %v574_v38 = vld [vmem:[#allocation2 + $0x18] sm:$0xff] (!%p563_p9)  ;;  %v575_v39 = vld [vmem:[#allocation2 + $0x20] sm:$0xff] (!%p563_p9)  ;;  %v576_v40 = vld [vmem:[#allocation2 + $0x28] sm:$0xff] (!%p563_p9)  ;;  %v1236_v45 = vcombine.low (!%p563_p9), %v1588_v5, %v1593_v6  ;;  %v1240_v46 = vcombine.low (!%p563_p9), %v1628_v13, %v1633_v14  ;;  %v1237_v47 = vcombine.low (!%p563_p9), %v1598_v7, %v1603_v8 }
 0x11e   : > { %1356 = vmatpush3.bf16.msra.mxu0 (!%p563_p9), %v571_v33  ;;  %1443 = vmatpush3.bf16.msra.mxu1 (!%p563_p9), %v571_v33  ;;  %v577_v41 = vld [vmem:[#allocation2 + $0x30] sm:$0xff] (!%p563_p9)  ;;  %v578_v42 = vld [vmem:[#allocation2 + $0x38] sm:$0xff] (!%p563_p9)  ;;  %v1241_v48 = vcombine.low (!%p563_p9), %v1638_v15, %v1643_v16  ;;  %v579_v51 = vld [vmem:[#allocation3] sm:$0xff] (!%p563_p9) }
 0x11f   : > { %1357 = vmatprep.subr.bf16.mxu0 (!%p563_p9), %v572_v34  ;;  %1436 = vmatprep.subr.bf16.mxu1 (!%p563_p9), %v572_v34  ;;  %v581_v49 = vld [vmem:[#allocation3 + $0x10] sm:$0xff] (!%p563_p9)  ;;  %v587_v52 = vld [vmem:[#allocation3 + $0x40] sm:$0xff] (!%p563_p9)  ;;  %v582_v55 = vld [vmem:[#allocation3 + $0x18] sm:$0xff] (!%p563_p9) }
 0x120   : > { %1371 = vmatprep.mubr.bf16.mxu0 (!%p563_p9), %v1234_v35  ;;  %1379 = vmatprep.mubr.bf16.mxu1 (!%p563_p9), %v1238_v36  ;;  %v589_v50 = vld [vmem:[#allocation3 + $0x50] sm:$0xff] (!%p563_p9)  ;;  %v590_v56 = vld [vmem:[#allocation3 + $0x58] sm:$0xff] (!%p563_p9)  ;;  %v580_v61 = vld [vmem:[#allocation3 + $0x8] sm:$0xff] (!%p563_p9) }
 0x121   : > { %v588_v62 = vld [vmem:[#allocation3 + $0x48] sm:$0xff] (!%p563_p9)  ;;  %v585_v25 = vld [vmem:[#allocation3 + $0x30] sm:$0xff] (!%p563_p9)  ;;  %v583_v27 = vld [vmem:[#allocation3 + $0x20] sm:$0xff] (!%p563_p9) }
 0x122   : > { %1358 = vmatpush3.bf16.msra.mxu0 (!%p563_p9), %v572_v34  ;;  %1444 = vmatpush3.bf16.msra.mxu1 (!%p563_p9), %v572_v34  ;;  %v593_v26 = vld [vmem:[#allocation3 + $0x70] sm:$0xff] (!%p563_p9)  ;;  %v591_v28 = vld [vmem:[#allocation3 + $0x60] sm:$0xff] (!%p563_p9)  ;;  %v586_v31 = vld [vmem:[#allocation3 + $0x38] sm:$0xff] (!%p563_p9) }
 0x123   : > { %1359 = vmatprep.subr.bf16.mxu0 (!%p563_p9), %v573_v37  ;;  %1437 = vmatprep.subr.bf16.mxu1 (!%p563_p9), %v573_v37  ;;  %v594_v32 = vld [vmem:[#allocation3 + $0x78] sm:$0xff] (!%p563_p9) }
 0x126   : > { %1360 = vmatpush3.bf16.msra.mxu0 %v573_v37  ;;  %1445 = vmatpush3.bf16.msra.mxu1 %v573_v37  ;;  %v584_v37 = vld [vmem:[#allocation3 + $0x28] sm:$0xff] }
 0x127   : > { %1361 = vmatprep.subr.bf16.mxu0 %v574_v38  ;;  %1438 = vmatprep.subr.bf16.mxu1 %v574_v38 }
 0x12a   : > { %1362 = vmatpush3.bf16.msra.mxu0 %v574_v38  ;;  %1446 = vmatpush3.bf16.msra.mxu1 %v574_v38  ;;  %v592_v38 = vld [vmem:[#allocation3 + $0x68] sm:$0xff] }
 0x12b   : > { %1363 = vmatprep.subr.bf16.mxu0 %v575_v39  ;;  %1439 = vmatprep.subr.bf16.mxu1 %v575_v39 }
 0x12e   : > { %1364 = vmatpush3.bf16.msra.mxu0 %v575_v39  ;;  %1447 = vmatpush3.bf16.msra.mxu1 %v575_v39 }
 0x12f   : > { %1365 = vmatprep.subr.bf16.mxu0 %v576_v40  ;;  %1440 = vmatprep.subr.bf16.mxu1 %v576_v40 }
 0x132   : > { %1366 = vmatpush3.bf16.msra.mxu0 %v576_v40  ;;  %1448 = vmatpush3.bf16.msra.mxu1 %v576_v40 }
 0x133   : > { %1367 = vmatprep.subr.bf16.mxu0 %v577_v41  ;;  %1441 = vmatprep.subr.bf16.mxu1 %v577_v41 }
 0x136   : > { %1368 = vmatpush3.bf16.msra.mxu0 %v577_v41  ;;  %1449 = vmatpush3.bf16.msra.mxu1 %v577_v41 }
 0x137   : > { %1369 = vmatprep.subr.bf16.mxu0 %v578_v42  ;;  %1442 = vmatprep.subr.bf16.mxu1 %v578_v42 }
 0x13a   : > { %1370 = vmatpush3.bf16.msra.mxu0 %v578_v42  ;;  %1450 = vmatpush3.bf16.msra.mxu1 %v578_v42 }
 0x13d   : > { %1372 = vmatmul.mubr.bf16.vlgmr.msra.gmra.mrb[0].mxu0 %v1235_v43  ;;  %1380 = vmatmul.mubr.bf16.vlgmr.msra.gmra.mrb[0].mxu1 %v1239_v44 }
 0x13e   : > { %1375 = vmatprep.mubr.bf16.mxu0 %v1236_v45  ;;  %1383 = vmatprep.mubr.bf16.mxu1 %v1240_v46 }
 0x145   : > { %1376 = vmatmul.mubr.bf16.gmra.mrb[4].mxu0 %v1237_v47  ;;  %1384 = vmatmul.mubr.bf16.gmra.mrb[4].mxu1 %v1241_v48 }
 0x210   : > { %v1373_v53 = vpop.f32.mrb[0].mxu0  ;;  %v1381_v54 = vpop.f32.mrb[0].mxu1 }
 0x211   : > { %v742_v57 = vadd.f32 %v1373_v53, %v581_v49  ;;  %v750_v58 = vadd.f32 %v1381_v54, %v589_v50  ;;  %v677_v59 = vpop.f32.mrb[1].mxu0  ;;  %v709_v60 = vpop.f32.mrb[1].mxu1 }
 0x212   : > { %v740_v63 = vadd.f32 %v677_v59, %v579_v51  ;;  %v748_v2 = vadd.f32 %v709_v60, %v587_v52  ;;  %v1374_v17 = vpop.f32.mrb[2].mxu0  ;;  %v1382_v18 = vpop.f32.mrb[2].mxu1 }
 0x213   : > { %758 = vst [vmem:[#allocation3 + $0x10] sm:$0xff] %v742_v57  ;;  %766 = vst [vmem:[#allocation3 + $0x50] sm:$0xff] %v750_v58  ;;  %v743_v19 = vadd.f32 %v1374_v17, %v582_v55  ;;  %v751_v20 = vadd.f32 %v1382_v18, %v590_v56  ;;  %v680_v21 = vpop.f32.mrb[3].mxu0  ;;  %v712_v22 = vpop.f32.mrb[3].mxu1 }
 0x214   : > { %756 = vst [vmem:[#allocation3] sm:$0xff] %v740_v63  ;;  %764 = vst [vmem:[#allocation3 + $0x40] sm:$0xff] %v748_v2  ;;  %v741_v23 = vadd.f32 %v680_v21, %v580_v61  ;;  %v749_v24 = vadd.f32 %v712_v22, %v588_v62 }
 0x215   : > { %759 = vst [vmem:[#allocation3 + $0x18] sm:$0xff] %v743_v19  ;;  %767 = vst [vmem:[#allocation3 + $0x58] sm:$0xff] %v751_v20 }
 0x216   : > { %757 = vst [vmem:[#allocation3 + $0x8] sm:$0xff] %v741_v23  ;;  %765 = vst [vmem:[#allocation3 + $0x48] sm:$0xff] %v749_v24 }
 0x218   : > { %v1377_v29 = vpop.f32.mrb[4].mxu0  ;;  %v1385_v30 = vpop.f32.mrb[4].mxu1 }
 0x219   : > { %v746_v33 = vadd.f32 %v1377_v29, %v585_v25  ;;  %v754_v34 = vadd.f32 %v1385_v30, %v593_v26  ;;  %v693_v35 = vpop.f32.mrb[5].mxu0  ;;  %v725_v36 = vpop.f32.mrb[5].mxu1 }
 0x21a   : > { %v744_v39 = vadd.f32 %v693_v35, %v583_v27  ;;  %v752_v40 = vadd.f32 %v725_v36, %v591_v28  ;;  %v1378_v41 = vpop.f32.mrb[6].mxu0  ;;  %v1386_v42 = vpop.f32.mrb[6].mxu1 }
 0x21b   : > { %762 = vst [vmem:[#allocation3 + $0x30] sm:$0xff] %v746_v33  ;;  %770 = vst [vmem:[#allocation3 + $0x70] sm:$0xff] %v754_v34  ;;  %v747_v43 = vadd.f32 %v1378_v41, %v586_v31  ;;  %v755_v44 = vadd.f32 %v1386_v42, %v594_v32  ;;  %v696_v45 = vpop.f32.mrb[7].mxu0  ;;  %v728_v46 = vpop.f32.mrb[7].mxu1 }
 0x21c   : > { %760 = vst [vmem:[#allocation3 + $0x20] sm:$0xff] %v744_v39  ;;  %768 = vst [vmem:[#allocation3 + $0x60] sm:$0xff] %v752_v40  ;;  %v745_v47 = vadd.f32 %v696_v45, %v584_v37  ;;  %v753_v48 = vadd.f32 %v728_v46, %v592_v38 }
 0x21d   : > { %763 = vst [vmem:[#allocation3 + $0x38] sm:$0xff] %v747_v43  ;;  %771 = vst [vmem:[#allocation3 + $0x78] sm:$0xff] %v755_v44 }
 0x21e   : > { %761 = vst [vmem:[#allocation3 + $0x28] sm:$0xff] %v745_v47  ;;  %769 = vst [vmem:[#allocation3 + $0x68] sm:$0xff] %v753_v48 }
 0x21f PF: > { %p772_p10 = scmp.eq.s32.totalorder %s1805_s22, 0 }
 0x221   : > { %p773_p11 = pnand %p772_p10, %p549_p7 }
 0x222   : > { %v1242_v49 = vld [vmem:[#allocation2 + $0x40] sm:$0xff] (!%p773_p11)  ;;  %v1243_v50 = vld [vmem:[#allocation2 + $0x48] sm:$0xff] (!%p773_p11)  ;;  %v1250_v51 = vcombine.low (!%p773_p11), %v1568_v0, %v1573_v1  ;;  %v1254_v52 = vcombine.low (!%p773_p11), %v1608_v9, %v1613_v10  ;;  %v1244_v53 = vld [vmem:[#allocation2 + $0x50] sm:$0xff] (!%p773_p11)  ;;  %v1251_v55 = vcombine.low (!%p773_p11), %v1578_v3, %v1583_v4  ;;  %v1255_v56 = vcombine.low (!%p773_p11), %v1618_v11, %v1623_v12 }
 0x223   : > { %776 = sbr.rel (%p773_p11) target bundleno = 805 (0x325), region = 48  ;;  %1387 = vmatprep.subr.bf16.mxu0 (!%p773_p11), %v1242_v49  ;;  %1451 = vmatprep.subr.bf16.mxu1 (!%p773_p11), %v1242_v49  ;;  %v1245_v54 = vld [vmem:[#allocation2 + $0x58] sm:$0xff] (!%p773_p11)  ;;  %v1246_v0 = vld [vmem:[#allocation2 + $0x60] sm:$0xff] (!%p773_p11)  ;;  %v1247_v1 = vld [vmem:[#allocation2 + $0x68] sm:$0xff] (!%p773_p11)  ;;  %v1252_v57 = vcombine.low (!%p773_p11), %v1588_v5, %v1593_v6  ;;  %v1256_v58 = vcombine.low (!%p773_p11), %v1628_v13, %v1633_v14  ;;  %v1253_v59 = vcombine.low (!%p773_p11), %v1598_v7, %v1603_v8 }
 0x224   : > { %1388 = vmatpush3.bf16.msra.mxu0 (!%p773_p11), %v1242_v49  ;;  %1459 = vmatpush3.bf16.msra.mxu1 (!%p773_p11), %v1242_v49  ;;  %v1248_v9 = vld [vmem:[#allocation2 + $0x70] sm:$0xff] (!%p773_p11)  ;;  %v1249_v10 = vld [vmem:[#allocation2 + $0x78] sm:$0xff] (!%p773_p11)  ;;  %v1257_v3 = vcombine.low (!%p773_p11), %v1638_v15, %v1643_v16  ;;  %v790_v12 = vld [vmem:[#allocation3] sm:$0xff] (!%p773_p11) }
 0x225   : > { %1389 = vmatprep.subr.bf16.mxu0 (!%p773_p11), %v1243_v50  ;;  %1452 = vmatprep.subr.bf16.mxu1 (!%p773_p11), %v1243_v50  ;;  %v792_v4 = vld [vmem:[#allocation3 + $0x10] sm:$0xff] (!%p773_p11)  ;;  %v798_v60 = vld [vmem:[#allocation3 + $0x40] sm:$0xff] (!%p773_p11)  ;;  %v793_v61 = vld [vmem:[#allocation3 + $0x18] sm:$0xff] (!%p773_p11) }
 0x226   : > { %1403 = vmatprep.mubr.bf16.mxu0 (!%p773_p11), %v1250_v51  ;;  %1411 = vmatprep.mubr.bf16.mxu1 (!%p773_p11), %v1254_v52  ;;  %v800_v11 = vld [vmem:[#allocation3 + $0x50] sm:$0xff] (!%p773_p11)  ;;  %v801_v13 = vld [vmem:[#allocation3 + $0x58] sm:$0xff] (!%p773_p11)  ;;  %v791_v17 = vld [vmem:[#allocation3 + $0x8] sm:$0xff] (!%p773_p11) }
 0x227   : > { %v799_v18 = vld [vmem:[#allocation3 + $0x48] sm:$0xff] (!%p773_p11)  ;;  %v796_v25 = vld [vmem:[#allocation3 + $0x30] sm:$0xff] (!%p773_p11)  ;;  %v794_v27 = vld [vmem:[#allocation3 + $0x20] sm:$0xff] (!%p773_p11) }
 0x228   : > { %1390 = vmatpush3.bf16.msra.mxu0 (!%p773_p11), %v1243_v50  ;;  %1460 = vmatpush3.bf16.msra.mxu1 (!%p773_p11), %v1243_v50  ;;  %v804_v26 = vld [vmem:[#allocation3 + $0x70] sm:$0xff] (!%p773_p11)  ;;  %v802_v28 = vld [vmem:[#allocation3 + $0x60] sm:$0xff] (!%p773_p11)  ;;  %v797_v31 = vld [vmem:[#allocation3 + $0x38] sm:$0xff] (!%p773_p11) }
 0x229   : > { %1391 = vmatprep.subr.bf16.mxu0 (!%p773_p11), %v1244_v53  ;;  %1453 = vmatprep.subr.bf16.mxu1 (!%p773_p11), %v1244_v53  ;;  %v805_v32 = vld [vmem:[#allocation3 + $0x78] sm:$0xff] (!%p773_p11)  ;;  %v795_v37 = vld [vmem:[#allocation3 + $0x28] sm:$0xff] (!%p773_p11) }
 0x22a   : > { %v803_v38 = vld [vmem:[#allocation3 + $0x68] sm:$0xff] }
 0x22c   : > { %1392 = vmatpush3.bf16.msra.mxu0 %v1244_v53  ;;  %1461 = vmatpush3.bf16.msra.mxu1 %v1244_v53 }
 0x22d   : > { %1393 = vmatprep.subr.bf16.mxu0 %v1245_v54  ;;  %1454 = vmatprep.subr.bf16.mxu1 %v1245_v54 }
 0x230   : > { %1394 = vmatpush3.bf16.msra.mxu0 %v1245_v54  ;;  %1462 = vmatpush3.bf16.msra.mxu1 %v1245_v54 }
 0x231   : > { %1395 = vmatprep.subr.bf16.mxu0 %v1246_v0  ;;  %1455 = vmatprep.subr.bf16.mxu1 %v1246_v0 }
 0x234   : > { %1396 = vmatpush3.bf16.msra.mxu0 %v1246_v0  ;;  %1463 = vmatpush3.bf16.msra.mxu1 %v1246_v0 }
 0x235   : > { %1397 = vmatprep.subr.bf16.mxu0 %v1247_v1  ;;  %1456 = vmatprep.subr.bf16.mxu1 %v1247_v1 }
 0x238   : > { %1398 = vmatpush3.bf16.msra.mxu0 %v1247_v1  ;;  %1464 = vmatpush3.bf16.msra.mxu1 %v1247_v1 }
 0x239   : > { %1399 = vmatprep.subr.bf16.mxu0 %v1248_v9  ;;  %1457 = vmatprep.subr.bf16.mxu1 %v1248_v9 }
 0x23c   : > { %1400 = vmatpush3.bf16.msra.mxu0 %v1248_v9  ;;  %1465 = vmatpush3.bf16.msra.mxu1 %v1248_v9 }
 0x23d   : > { %1401 = vmatprep.subr.bf16.mxu0 %v1249_v10  ;;  %1458 = vmatprep.subr.bf16.mxu1 %v1249_v10 }
 0x240   : > { %1402 = vmatpush3.bf16.msra.mxu0 %v1249_v10  ;;  %1466 = vmatpush3.bf16.msra.mxu1 %v1249_v10 }
 0x243   : > { %1404 = vmatmul.mubr.bf16.vlgmr.msra.gmra.mrb[0].mxu0 %v1251_v55  ;;  %1412 = vmatmul.mubr.bf16.vlgmr.msra.gmra.mrb[0].mxu1 %v1255_v56 }
 0x244   : > { %1407 = vmatprep.mubr.bf16.mxu0 %v1252_v57  ;;  %1415 = vmatprep.mubr.bf16.mxu1 %v1256_v58 }
 0x24b   : > { %1408 = vmatmul.mubr.bf16.gmra.mrb[4].mxu0 %v1253_v59  ;;  %1416 = vmatmul.mubr.bf16.gmra.mrb[4].mxu1 %v1257_v3 }
 0x316   : > { %v1405_v5 = vpop.f32.mrb[0].mxu0  ;;  %v1413_v6 = vpop.f32.mrb[0].mxu1 }
 0x317   : > { %v953_v14 = vadd.f32 %v1405_v5, %v792_v4  ;;  %v961_v62 = vadd.f32 %v1413_v6, %v800_v11  ;;  %v888_v63 = vpop.f32.mrb[1].mxu0  ;;  %v920_v2 = vpop.f32.mrb[1].mxu1 }
 0x318   : > { %v951_v7 = vadd.f32 %v888_v63, %v790_v12  ;;  %v959_v8 = vadd.f32 %v920_v2, %v798_v60  ;;  %v1406_v19 = vpop.f32.mrb[2].mxu0  ;;  %v1414_v15 = vpop.f32.mrb[2].mxu1 }
 0x319   : > { %969 = vst [vmem:[#allocation3 + $0x10] sm:$0xff] %v953_v14  ;;  %977 = vst [vmem:[#allocation3 + $0x50] sm:$0xff] %v961_v62  ;;  %v954_v16 = vadd.f32 %v1406_v19, %v793_v61  ;;  %v962_v20 = vadd.f32 %v1414_v15, %v801_v13  ;;  %v891_v21 = vpop.f32.mrb[3].mxu0  ;;  %v923_v22 = vpop.f32.mrb[3].mxu1 }
 0x31a   : > { %967 = vst [vmem:[#allocation3] sm:$0xff] %v951_v7  ;;  %975 = vst [vmem:[#allocation3 + $0x40] sm:$0xff] %v959_v8  ;;  %v952_v23 = vadd.f32 %v891_v21, %v791_v17  ;;  %v960_v24 = vadd.f32 %v923_v22, %v799_v18 }
 0x31b   : > { %970 = vst [vmem:[#allocation3 + $0x18] sm:$0xff] %v954_v16  ;;  %978 = vst [vmem:[#allocation3 + $0x58] sm:$0xff] %v962_v20 }
 0x31c   : > { %968 = vst [vmem:[#allocation3 + $0x8] sm:$0xff] %v952_v23  ;;  %976 = vst [vmem:[#allocation3 + $0x48] sm:$0xff] %v960_v24 }
 0x31e   : > { %v1409_v29 = vpop.f32.mrb[4].mxu0  ;;  %v1417_v30 = vpop.f32.mrb[4].mxu1 }
 0x31f   : > { %v957_v33 = vadd.f32 %v1409_v29, %v796_v25  ;;  %v965_v34 = vadd.f32 %v1417_v30, %v804_v26  ;;  %v904_v35 = vpop.f32.mrb[5].mxu0  ;;  %v936_v36 = vpop.f32.mrb[5].mxu1 }
 0x320   : > { %v955_v39 = vadd.f32 %v904_v35, %v794_v27  ;;  %v963_v40 = vadd.f32 %v936_v36, %v802_v28  ;;  %v1410_v41 = vpop.f32.mrb[6].mxu0  ;;  %v1418_v42 = vpop.f32.mrb[6].mxu1 }
 0x321   : > { %973 = vst [vmem:[#allocation3 + $0x30] sm:$0xff] %v957_v33  ;;  %981 = vst [vmem:[#allocation3 + $0x70] sm:$0xff] %v965_v34  ;;  %v958_v43 = vadd.f32 %v1410_v41, %v797_v31  ;;  %v966_v44 = vadd.f32 %v1418_v42, %v805_v32  ;;  %v907_v45 = vpop.f32.mrb[7].mxu0  ;;  %v939_v46 = vpop.f32.mrb[7].mxu1 }
 0x322   : > { %971 = vst [vmem:[#allocation3 + $0x20] sm:$0xff] %v955_v39  ;;  %979 = vst [vmem:[#allocation3 + $0x60] sm:$0xff] %v963_v40  ;;  %v956_v47 = vadd.f32 %v907_v45, %v795_v37  ;;  %v964_v48 = vadd.f32 %v939_v46, %v803_v38 }
 0x323   : > { %974 = vst [vmem:[#allocation3 + $0x38] sm:$0xff] %v958_v43  ;;  %982 = vst [vmem:[#allocation3 + $0x78] sm:$0xff] %v966_v44 }
 0x324   : > { %972 = vst [vmem:[#allocation3 + $0x28] sm:$0xff] %v956_v47  ;;  %980 = vst [vmem:[#allocation3 + $0x68] sm:$0xff] %v964_v48 }
 0x325 PF: > { %p1258_p12 = scmp.ne.s32.totalorder %s1514_s12, 1 }
 0x326   : > { %v990_v49 = vld [vmem:[#allocation3] sm:$0xff] (!%p1258_p12)  ;;  %v991_v51 = vld [vmem:[#allocation3 + $0x8] sm:$0xff] (!%p1258_p12)  ;;  %v992_v54 = vld [vmem:[#allocation3 + $0x10] sm:$0xff] (!%p1258_p12) }
 0x327   : > { %989 = sbr.rel (%p1258_p12) target bundleno = 818 (0x332), region = 56  ;;  %v1259_v50 = vld [vmem:[%s1796_s2] ss:$0 sm:$0xff] (!%p1258_p12)  ;;  %v993_v0 = vld [vmem:[#allocation3 + $0x18] sm:$0xff] (!%p1258_p12)  ;;  %v999_v12 = vld [vmem:[#allocation3 + $0x48] sm:$0xff] (!%p1258_p12) }
 0x328   : > { %v1013_v52 = vadd.f32 (!%p1258_p12), %v1259_v50, %v990_v49  ;;  %v1014_v53 = vadd.f32 (!%p1258_p12), %v1259_v50, %v991_v51  ;;  %v1015_v9 = vadd.f32 (!%p1258_p12), %v1259_v50, %v992_v54  ;;  %v1016_v10 = vadd.f32 (!%p1258_p12), %v1259_v50, %v993_v0  ;;  %v996_v57 = vld [vmem:[#allocation3 + $0x30] sm:$0xff] (!%p1258_p12)  ;;  %v998_v11 = vld [vmem:[#allocation3 + $0x40] sm:$0xff] (!%p1258_p12)  ;;  %v1001_v13 = vld [vmem:[#allocation3 + $0x58] sm:$0xff] (!%p1258_p12) }
 0x329   : > { %v994_v1 = vld [vmem:[#allocation3 + $0x20] sm:$0xff] (!%p1258_p12)  ;;  %v1019_v3 = vadd.f32 (!%p1258_p12), %v1259_v50, %v996_v57  ;;  %v1000_v60 = vld [vmem:[#allocation3 + $0x50] sm:$0xff] (!%p1258_p12)  ;;  %v1021_v5 = vadd.f32 (!%p1258_p12), %v1259_v50, %v998_v11  ;;  %v1022_v6 = vadd.f32 (!%p1258_p12), %v1259_v50, %v999_v12  ;;  %v1024_v63 = vadd.f32 (!%p1258_p12), %v1259_v50, %v1001_v13 }
 0x32a   : > { %v1017_v55 = vadd.f32 (!%p1258_p12), %v1259_v50, %v994_v1  ;;  %v997_v58 = vld [vmem:[#allocation3 + $0x38] sm:$0xff] (!%p1258_p12)  ;;  %1029 = vst [vmem:[%s1797_s3] sm:$0xff] (!%p1258_p12), %v1013_v52  ;;  %1030 = vst [vmem:[%s1797_s3 + $0x8] sm:$0xff] (!%p1258_p12), %v1014_v53  ;;  %v1023_v61 = vadd.f32 (!%p1258_p12), %v1259_v50, %v1000_v60  ;;  %v1002_v14 = vld [vmem:[#allocation3 + $0x60] sm:$0xff] (!%p1258_p12) }
 0x32b   : > { %v995_v56 = vld [vmem:[#allocation3 + $0x28] sm:$0xff] (!%p1258_p12)  ;;  %v1020_v4 = vadd.f32 (!%p1258_p12), %v1259_v50, %v997_v58  ;;  %1031 = vst [vmem:[%s1797_s3 + $0x10] sm:$0xff] (!%p1258_p12), %v1015_v9  ;;  %1032 = vst [vmem:[%s1797_s3 + $0x18] sm:$0xff] (!%p1258_p12), %v1016_v10  ;;  %v1025_v2 = vadd.f32 (!%p1258_p12), %v1259_v50, %v1002_v14  ;;  %v1004_v18 = vld [vmem:[#allocation3 + $0x70] sm:$0xff] (!%p1258_p12) }
 0x32c   : > { %v1018_v59 = vadd.f32 (!%p1258_p12), %v1259_v50, %v995_v56  ;;  %1033 = vst [vmem:[%s1797_s3 + $0x20] sm:$0xff] (!%p1258_p12), %v1017_v55  ;;  %v1003_v62 = vld [vmem:[#allocation3 + $0x68] sm:$0xff] (!%p1258_p12)  ;;  %1035 = vst [vmem:[%s1797_s3 + $0x30] sm:$0xff] (!%p1258_p12), %v1019_v3  ;;  %v1005_v7 = vld [vmem:[#allocation3 + $0x78] sm:$0xff] (!%p1258_p12)  ;;  %v1027_v8 = vadd.f32 (!%p1258_p12), %v1259_v50, %v1004_v18 }
 0x32d   : > { %1036 = vst [vmem:[%s1797_s3 + $0x38] sm:$0xff] (!%p1258_p12), %v1020_v4  ;;  %v1026_v17 = vadd.f32 (!%p1258_p12), %v1259_v50, %v1003_v62  ;;  %1037 = vst [vmem:[%s1797_s3 + $0x40] sm:$0xff] (!%p1258_p12), %v1021_v5  ;;  %v1028_v19 = vadd.f32 (!%p1258_p12), %v1259_v50, %v1005_v7 }
 0x32e   : > { %1034 = vst [vmem:[%s1797_s3 + $0x28] sm:$0xff] %v1018_v59  ;;  %1038 = vst [vmem:[%s1797_s3 + $0x48] sm:$0xff] %v1022_v6 }
 0x32f   : > { %1039 = vst [vmem:[%s1797_s3 + $0x50] sm:$0xff] %v1023_v61  ;;  %1040 = vst [vmem:[%s1797_s3 + $0x58] sm:$0xff] %v1024_v63 }
 0x330   : > { %1041 = vst [vmem:[%s1797_s3 + $0x60] sm:$0xff] %v1025_v2  ;;  %1042 = vst [vmem:[%s1797_s3 + $0x68] sm:$0xff] %v1026_v17 }
 0x331   : > { %1043 = vst [vmem:[%s1797_s3 + $0x70] sm:$0xff] %v1027_v8  ;;  %1044 = vst [vmem:[%s1797_s3 + $0x78] sm:$0xff] %v1028_v19 }
 0x332 PF: > { %p1260_p13 = scmp.eq.s32.totalorder %s1514_s12, 1 }
 0x333   : > { %v1049_v15 = vld [vmem:[#allocation3] sm:$0xff] (!%p1260_p13)  ;;  %v1050_v16 = vld [vmem:[#allocation3 + $0x8] sm:$0xff] (!%p1260_p13)  ;;  %v1051_v20 = vld [vmem:[#allocation3 + $0x10] sm:$0xff] (!%p1260_p13)  ;;  %p1261_p0 = scmp.ne.s32.totalorder (!%p1260_p13), %s1805_s22, 0 }
 0x334   : > { %1048 = sbr.rel (%p1260_p13) target bundleno = 843 (0x34b), region = 60  ;;  %v1052_v21 = vld [vmem:[#allocation3 + $0x18] sm:$0xff] (!%p1260_p13)  ;;  %v1053_v22 = vld [vmem:[#allocation3 + $0x20] sm:$0xff] (!%p1260_p13)  ;;  %v1054_v23 = vld [vmem:[#allocation3 + $0x28] sm:$0xff] (!%p1260_p13)  ;;  %v1065_v24 = vpack.c.bf16 (!%p1260_p13), %v1050_v16, %v1049_v15 }
 0x335   : > { %v1055_v25 = vld [vmem:[#allocation3 + $0x30] sm:$0xff] (!%p1260_p13)  ;;  %v1056_v26 = vld [vmem:[#allocation3 + $0x38] sm:$0xff] (!%p1260_p13)  ;;  %v1057_v27 = vld [vmem:[#allocation3 + $0x40] sm:$0xff] (!%p1260_p13)  ;;  %v1066_v28 = vpack.c.bf16 (!%p1260_p13), %v1052_v21, %v1051_v20  ;;  %v1067_v29 = vpack.c.bf16 (!%p1260_p13), %v1054_v23, %v1053_v22 }
 0x336   : > { %v1058_v30 = vld [vmem:[#allocation3 + $0x48] sm:$0xff] (!%p1260_p13)  ;;  %v1059_v31 = vld [vmem:[#allocation3 + $0x50] sm:$0xff] (!%p1260_p13)  ;;  %v1060_v32 = vld [vmem:[#allocation3 + $0x58] sm:$0xff] (!%p1260_p13)  ;;  %v1068_v33 = vpack.c.bf16 (!%p1260_p13), %v1056_v26, %v1055_v25 }
 0x337   : > { %v1061_v34 = vld [vmem:[#allocation3 + $0x60] sm:$0xff] (!%p1260_p13)  ;;  %v1062_v35 = vld [vmem:[#allocation3 + $0x68] sm:$0xff] (!%p1260_p13)  ;;  %v1063_v36 = vld [vmem:[#allocation3 + $0x70] sm:$0xff] (!%p1260_p13)  ;;  %v1069_v37 = vpack.c.bf16 (!%p1260_p13), %v1058_v30, %v1057_v27  ;;  %v1070_v38 = vpack.c.bf16 (!%p1260_p13), %v1060_v32, %v1059_v31 }
 0x338   : > { %v1064_v39 = vld [vmem:[#allocation3 + $0x78] sm:$0xff] (!%p1260_p13)  ;;  %v1071_v40 = vpack.c.bf16 (!%p1260_p13), %v1062_v35, %v1061_v34 }
 0x339   : > { %v1072_v41 = vpack.c.bf16 (!%p1260_p13), %v1064_v39, %v1063_v36 }
 0x33b   : > { %1076 = sbr.rel (%p1261_p0) target bundleno = 834 (0x342), region = 64  ;;  %1081 = vst [vmem:[#allocation2] sm:$0xff] (!%p1261_p0), %v1065_v24  ;;  %1082 = vst [vmem:[#allocation2 + $0x8] sm:$0xff] (!%p1261_p0), %v1066_v28 }
 0x33c   : > { %1083 = vst [vmem:[#allocation2 + $0x10] sm:$0xff] (!%p1261_p0), %v1067_v29  ;;  %1084 = vst [vmem:[#allocation2 + $0x18] sm:$0xff] (!%p1261_p0), %v1068_v33 }
 0x33d   : > { %1085 = vst [vmem:[#allocation2 + $0x20] sm:$0xff] (!%p1261_p0), %v1069_v37  ;;  %1086 = vst [vmem:[#allocation2 + $0x28] sm:$0xff] (!%p1261_p0), %v1070_v38 }
 0x33e   : > { %1087 = vst [vmem:[#allocation2 + $0x30] sm:$0xff] (!%p1261_p0), %v1071_v40  ;;  %1088 = vst [vmem:[#allocation2 + $0x38] sm:$0xff] (!%p1261_p0), %v1072_v41 }
 0x342 PF: > { %p1262_p1 = scmp.ne.s32.totalorder %s1805_s22, 1 }
 0x343   : > { %1263 = vst [vmem:[#allocation2 + $0x40] sm:$0xff] (!%p1262_p1), %v1065_v24  ;;  %1264 = vst [vmem:[#allocation2 + $0x48] sm:$0xff] (!%p1262_p1), %v1066_v28 }
 0x344   : > { %1091 = sbr.rel (%p1262_p1) target bundleno = 843 (0x34b), region = 68  ;;  %1265 = vst [vmem:[#allocation2 + $0x50] sm:$0xff] (!%p1262_p1), %v1067_v29  ;;  %1266 = vst [vmem:[#allocation2 + $0x58] sm:$0xff] (!%p1262_p1), %v1068_v33 }
 0x345   : > { %1267 = vst [vmem:[#allocation2 + $0x60] sm:$0xff] (!%p1262_p1), %v1069_v37  ;;  %1268 = vst [vmem:[#allocation2 + $0x68] sm:$0xff] (!%p1262_p1), %v1070_v38 }
 0x346   : > { %1269 = vst [vmem:[#allocation2 + $0x70] sm:$0xff] (!%p1262_p1), %v1071_v40  ;;  %1270 = vst [vmem:[#allocation2 + $0x78] sm:$0xff] (!%p1262_p1), %v1072_v41 }
 0x34b PF: > { %s13_s14 = sadd.s32 1, %s1522_s14   ;;  %s1798_s12 = smov %s1518_s13 }
 0x34c   : > { %p10_p2 = scmp.ge.s32.totalorder %s13_s14, 4   ;;  %s1799_s13 = smov %s1801_s15 }
 0x34e   :  { %12 = sbr.rel (!%p10_p2) target bundleno = 2 (0x2), region = 105 }

</bundles_post_ra>
